<compile_context>
chip_gen: v5e
topology: v5e:2x2
jax: 0.10.0
libtpu: 0.0.40
codegen_flags: <defaults>
</compile_context>

<pallas_src>
import jax
import jax.numpy as jnp
from jax.experimental import pallas as pl
from jax.experimental.pallas import tpu as pltpu

EPS = 1e-06


def make_tcn_kernel(num_blocks: int, kernel_size: int, t_pad: int, t_real: int,
                    c_mid: int):
    K = kernel_size
    center = (K - 1) // 2
    padded = t_pad != t_real
    n_valid = float(c_mid * t_real)

    def kernel(x_ref, refb_ref, w1a_ref, wfold_ref, w3a_ref, b3a_ref,
               pch_ref, wd_ref, alphas_ref, o_ref):
        # time-index row reused by the depthwise boundary masks / tail mask
        t_idx = jax.lax.broadcasted_iota(jnp.int32, (1, t_pad), 1)
        valid = (t_idx < t_real) if padded else None

        def prelu(y, alpha):
            return jnp.where(y >= 0, y, alpha * y)

        def gln(y, gamma, beta):
            # GlobalLayerNorm over (C, T): single-pass sums, affine folded into
            # a single scale/shift so the big tile is touched only twice.
            cs = jnp.sum(y, axis=0, keepdims=True)          # (1, Tpad)
            css = jnp.sum(y * y, axis=0, keepdims=True)     # (1, Tpad)
            if padded:                                      # mask the tail on the
                cs = jnp.where(valid, cs, 0.0)              # cheap column sums
                css = jnp.where(valid, css, 0.0)
            s = jnp.sum(cs, keepdims=True)                  # (1, 1)
            ss = jnp.sum(css, keepdims=True)                # (1, 1)
            mean = s / n_valid
            var = jnp.maximum(ss / n_valid - mean * mean, 0.0)
            inv = jax.lax.rsqrt(var + EPS)
            scale = gamma * inv                             # (Cmid, 1)
            shift = beta - scale * mean                     # (Cmid, 1)
            return y * scale + shift

        def middle(m, blk, dilation):
            # PReLU -> GLN -> depthwise dilated conv -> PReLU -> GLN
            pp = pch_ref[blk]                               # (Cmid, 6) packed
            y = prelu(m, alphas_ref[blk, 0])
            y = gln(y, pp[:, 1:2], pp[:, 2:3])

            wd = wd_ref[blk]                                # (Cmid, K)
            # seed from the (always valid) center tap + bias: no broadcast
            # materialization of the bias over (C, T).
            acc = y * wd[:, center:center + 1] + pp[:, 3:4]
            for k in range(K):                              # static tap unroll
                if k == center:
                    continue
                off = (k - center) * dilation
                shifted = pltpu.roll(y, shift=(-off) % t_pad, axis=1)
                mask = jnp.logical_and(t_idx + off >= 0, t_idx + off < t_real)
                acc = acc + jnp.where(mask, shifted, 0.0) * wd[:, k:k + 1]

            y = prelu(acc, alphas_ref[blk, 1])
            return gln(y, pp[:, 4:5], pp[:, 5:6])

        x = x_ref[0].astype(jnp.float32)                    # (Cx, Tpad)

        # ---- block 0 (FirstTCNBlock): speaker-reference columns of w1 and b1
        #      are pre-folded into refb (per-channel bias), residual fused ----
        m = jnp.dot(w1a_ref[0], x, preferred_element_type=jnp.float32) + refb_ref[0]
        y = middle(m, 0, 1)
        h = jnp.dot(w3a_ref[0], y, preferred_element_type=jnp.float32) + b3a_ref[0] + x

        if num_blocks >= 2:
            # enter middle-channel space once; interior block boundaries use the
            # pre-folded (Cmid, Cmid) matrices, only the last block exits to Cx.
            m = jnp.dot(w1a_ref[1], h, preferred_element_type=jnp.float32) \
                + pch_ref[1][:, 0:1]
            for blk in range(1, num_blocks):
                y = middle(m, blk, 2 ** blk)
                if blk < num_blocks - 1:
                    m = jnp.dot(wfold_ref[blk], y,
                                preferred_element_type=jnp.float32) \
                        + pch_ref[blk + 1][:, 0:1]
                else:
                    h = jnp.dot(w3a_ref[1], y,
                                preferred_element_type=jnp.float32) + b3a_ref[1]

        o_ref[0] = h.astype(o_ref.dtype)

    return kernel


def _pick_vmem_limit(c_x, c_mid, t_pad, weight_bytes):
    # double-buffered in/out (Cx, Tpad) blocks + ~a dozen live f32 (Cmid, Tpad)
    # intermediates + (double-buffered) weight stacks, plus slack.
    need = (4 * c_x + 12 * c_mid) * t_pad * 4 + 2 * weight_bytes + (4 << 20)
    try:
        cap = pltpu.get_tpu_info().vmem_capacity_bytes
    except Exception:
        cap = 128 << 20
    ceiling = (cap * 3) // 4          # v5e/v6e: ~96 MiB, v7x (64 MiB): ~48 MiB
    return int(min(max(need, 32 << 20), ceiling))


def tcn_forward(x_bct, audio_reference_bc1, params_list, kernel_size: int):
    """Full TCN forward.

    x_bct:               (B, Cx, T)  — PyTorch NCT layout
    audio_reference_bc1: (B, Cref, 1)
    Returns (B, Cx, T) float32.
    """
    assert kernel_size % 2 == 1, "odd kernel_size required to preserve length"
    x = x_bct.astype(jnp.float32)
    B, Cx, T = x.shape
    ref = audio_reference_bc1.astype(jnp.float32)
    NB = len(params_list)
    Cmid = params_list[0]["w1"].shape[0]
    K = kernel_size

    # lane-dense time axis: pad to a multiple of 128; tail masked in-kernel.
    Tpad = max(128, ((T + 127) // 128) * 128)
    if Tpad != T:
        x = jnp.pad(x, ((0, 0), (0, 0), (0, Tpad - T)))

    p0 = params_list[0]
    w1_x0 = p0["w1"][:, :Cx]                                  # (Cmid, Cx)
    w1_refpart = p0["w1"][:, Cx:]                             # (Cmid, Cref)
    # speaker ref is constant over T -> per-channel bias; fold block-0 b1 in.
    ref_bias = jnp.einsum("mc,bco->bmo", w1_refpart, ref) + p0["b1"][None]

    # entry matrices from Cx space (block 0 and, if present, block 1)
    w1a = jnp.stack([w1_x0, params_list[1]["w1"] if NB > 1 else w1_x0])
    # exit matrices back to Cx space (block 0 and the last block)
    w3a = jnp.stack([p0["w3"], params_list[-1]["w3"]])
    b3a = jnp.stack([p0["b3"], params_list[-1]["b3"]])

    # interior fold: Wfold_i = w1_{i+1} @ w3_i, bias folded into next entry.
    wfold_list, entry_bias = [], []
    for i, p in enumerate(params_list):
        if 1 <= i <= NB - 2:
            wfold_list.append(params_list[i + 1]["w1"] @ p["w3"])
        else:
            wfold_list.append(jnp.zeros((Cmid, Cmid), jnp.float32))
        if i <= 1:
            entry_bias.append(p["b1"])
        else:
            entry_bias.append(p["w1"] @ params_list[i - 1]["b3"] + p["b1"])
    wfold = jnp.stack(wfold_list)                             # (NB, Cmid, Cmid)

    # pack all per-channel params into one lane-packed array:
    # cols = [entry_bias, gamma1, beta1, dw_bias, gamma2, beta2]
    pch = jnp.stack([
        jnp.concatenate([entry_bias[i], p["g1"], p["be1"], p["bd"],
                         p["g2"], p["be2"]], axis=1)
        for i, p in enumerate(params_list)])                  # (NB, Cmid, 6)
    wd = jnp.stack([p["wd"] for p in params_list])            # (NB, Cmid, K)
    alphas = jnp.stack([p["alphas"] for p in params_list])    # (NB, 2)

    consts = (w1a, wfold, w3a, b3a, pch, wd)
    weight_bytes = int(sum(a.size * a.dtype.itemsize for a in consts))
    vmem_limit = _pick_vmem_limit(Cx, Cmid, Tpad, weight_bytes)

    kernel = make_tcn_kernel(NB, K, Tpad, T, Cmid)
    const = lambda shape: pl.BlockSpec(shape, lambda b: (0,) * len(shape))

    out = pl.pallas_call(
        kernel,
        out_shape=jax.ShapeDtypeStruct((B, Cx, Tpad), jnp.float32),
        grid=(B,),
        in_specs=[
            pl.BlockSpec((1, Cx, Tpad), lambda b: (b, 0, 0)),   # x
            pl.BlockSpec((1, Cmid, 1), lambda b: (b, 0, 0)),    # ref bias
            const((2, Cmid, Cx)),        # entry 1x1 weights (blocks 0, 1)
            const((NB, Cmid, Cmid)),     # folded interior 1x1 weights
            const((2, Cx, Cmid)),        # exit 1x1 weights (block 0, last)
            const((2, Cx, 1)),           # exit biases
            const((NB, Cmid, 6)),        # packed per-channel params
            const((NB, Cmid, K)),        # depthwise weights
            pl.BlockSpec(memory_space=pltpu.MemorySpace.SMEM),  # PReLU alphas
        ],
        out_specs=pl.BlockSpec((1, Cx, Tpad), lambda b: (b, 0, 0)),
        compiler_params=pltpu.CompilerParams(
            dimension_semantics=("parallel",),   # batch across v7x's 2 TCs
            vmem_limit_bytes=vmem_limit,
        ),
    )(x, ref_bias, w1a, wfold, w3a, b3a, pch, wd, alphas)

    return out if Tpad == T else out[:, :, :T]


def init_block_params(key, c_in, c_mid, c_out, ksize):
    ks = jax.random.split(key, 6)
    s = 0.1
    return dict(
        w1=jax.random.normal(ks[0], (c_mid, c_in), jnp.float32) * s,
        b1=jax.random.normal(ks[1], (c_mid, 1), jnp.float32) * s,
        g1=jnp.ones((c_mid, 1), jnp.float32),
        be1=jnp.zeros((c_mid, 1), jnp.float32),
        wd=jax.random.normal(ks[2], (c_mid, ksize), jnp.float32) * s,
        bd=jax.random.normal(ks[3], (c_mid, 1), jnp.float32) * s,
        g2=jnp.ones((c_mid, 1), jnp.float32),
        be2=jnp.zeros((c_mid, 1), jnp.float32),
        w3=jax.random.normal(ks[4], (c_out, c_mid), jnp.float32) * s,
        b3=jax.random.normal(ks[5], (c_out, 1), jnp.float32) * s,
        alphas=jnp.array([0.25, 0.25], jnp.float32),   # PyTorch PReLU default
    )


def tcn_reference(x, audio_reference, params_list, kernel_size):
    """Pure-JAX f32 reference mirroring the PyTorch module exactly."""
    def gln(y, gamma, beta):
        mean = jnp.mean(y, axis=(1, 2), keepdims=True)
        var = jnp.mean((y - mean) ** 2, axis=(1, 2), keepdims=True)
        return gamma[None] * ((y - mean) / jnp.sqrt(var + EPS)) + beta[None]

    def prelu(y, a):
        return jnp.where(y >= 0, y, a * y)

    def block(h, p, dilation):
        T = h.shape[-1]
        y = jnp.einsum("mc,bct->bmt", p["w1"], h) + p["b1"][None]
        y = prelu(y, p["alphas"][0])
        y = gln(y, p["g1"], p["be1"])
        pad = dilation * (kernel_size - 1) // 2
        yp = jnp.pad(y, ((0, 0), (0, 0), (pad, pad)))
        acc = jnp.broadcast_to(p["bd"][None], y.shape)
        for k in range(kernel_size):
            acc = acc + p["wd"][None, :, k:k + 1] * yp[:, :, k * dilation:k * dilation + T]
        y = prelu(acc, p["alphas"][1])
        y = gln(y, p["g2"], p["be2"])
        return jnp.einsum("om,bmt->bot", p["w3"], y) + p["b3"][None]

    B, Cx, T = x.shape
    ref_rep = jnp.broadcast_to(audio_reference, (B, audio_reference.shape[1], T))
    h = jnp.concatenate([x, ref_rep], axis=1)
    out = block(h, params_list[0], 1) + x
    for i, p in enumerate(params_list[1:], start=1):
        out = block(out, p, 2 ** i)
    return out


if __name__ == "__main__":
    key = jax.random.PRNGKey(0)

    B = 2          # batch
    Cx = 16        # speech-feature channels == out_channels (residual path)
    Cref = 8       # speaker-reference channels
    Cmid = 32      # middle_channels
    K = 3          # kernel_size (odd -> length preserved)
    NUM_BLOCKS = 3 # num_tcn_blocks (dilations 1, 2, 4)

    kx, kr, kp = jax.random.split(key, 3)
    pkeys = jax.random.split(kp, NUM_BLOCKS)
    params = [init_block_params(pkeys[0], Cx + Cref, Cmid, Cx, K)]
    for i in range(1, NUM_BLOCKS):
        params.append(init_block_params(pkeys[i], Cx, Cmid, Cx, K))

    # T=128 exercises the pure lane-dense path; T=100 exercises the padded
    # tail (masked GLN statistics + masked depthwise taps) path.
    for T in (128, 100):
        kx_t = jax.random.fold_in(kx, T)
        kr_t = jax.random.fold_in(kr, T)
        x = jax.random.normal(kx_t, (B, Cx, T), jnp.float32)
        audio_reference = jax.random.normal(kr_t, (B, Cref, 1), jnp.float32)

        out = jax.block_until_ready(tcn_forward(x, audio_reference, params, K))
        assert out.shape == (B, Cx, T), out.shape
        assert bool(jnp.all(jnp.isfinite(out)))

        ref_out = tcn_reference(x, audio_reference, params, K)
        max_err = float(jnp.max(jnp.abs(out - ref_out)))
        assert max_err < 0.1, f"T={T}: max abs err vs reference: {max_err}"

    print("KERNEL_OK")
</pallas_src>

<mosaic_0001>
module attributes {stable_mosaic.version = 11 : i64} {
  func.func @kernel(%arg0: i32, %arg1: memref<1x16x128xf32, #tpu.memory_space<vmem>>, %arg2: memref<1x32x1xf32, #tpu.memory_space<vmem>>, %arg3: memref<2x32x16xf32, #tpu.memory_space<vmem>>, %arg4: memref<3x32x32xf32, #tpu.memory_space<vmem>>, %arg5: memref<2x16x32xf32, #tpu.memory_space<vmem>>, %arg6: memref<2x16x1xf32, #tpu.memory_space<vmem>>, %arg7: memref<3x32x6xf32, #tpu.memory_space<vmem>>, %arg8: memref<3x32x3xf32, #tpu.memory_space<vmem>>, %arg9: memref<3x2xf32, #tpu.memory_space<smem>>, %arg10: memref<1x16x128xf32, #tpu.memory_space<vmem>>) attributes {dimension_semantics = [#tpu.dimension_semantics<parallel>], iteration_bounds = array<i64: 2>, scalar_prefetch = 0 : i64, scratch_operands = 0 : i64, tpu.core_type = #tpu.core_type<tc>, window_params = [{transform_indices = @transform_0, window_bounds = array<i64: 1, 16, 128>}, {transform_indices = @transform_1, window_bounds = array<i64: 1, 32, 1>}, {pipeline_mode = #tpu.pipeline_mode<synchronous>, transform_indices = @transform_2, window_bounds = array<i64: 2, 32, 16>}, {pipeline_mode = #tpu.pipeline_mode<synchronous>, transform_indices = @transform_3, window_bounds = array<i64: 3, 32, 32>}, {pipeline_mode = #tpu.pipeline_mode<synchronous>, transform_indices = @transform_4, window_bounds = array<i64: 2, 16, 32>}, {pipeline_mode = #tpu.pipeline_mode<synchronous>, transform_indices = @transform_5, window_bounds = array<i64: 2, 16, 1>}, {pipeline_mode = #tpu.pipeline_mode<synchronous>, transform_indices = @transform_6, window_bounds = array<i64: 3, 32, 6>}, {pipeline_mode = #tpu.pipeline_mode<synchronous>, transform_indices = @transform_7, window_bounds = array<i64: 3, 32, 3>}, {transform_indices = @transform_8, window_bounds = array<i64: 3, 2>}, {transform_indices = @transform_9, window_bounds = array<i64: 1, 16, 128>}]} {
    %0 = tpu.iota {dimensions = array<i32: 1>} : vector<1x128xi32>
    %c0 = arith.constant 0 : index
    %c0_0 = arith.constant 0 : index
    %c0_1 = arith.constant 0 : index
    %1 = vector.load %arg1[%c0, %c0_0, %c0_1] : memref<1x16x128xf32, #tpu.memory_space<vmem>>, vector<1x16x128xf32>
    %2 = vector.shape_cast %1 : vector<1x16x128xf32> to vector<16x128xf32>
    %c0_2 = arith.constant 0 : index
    %c0_3 = arith.constant 0 : index
    %c0_4 = arith.constant 0 : index
    %3 = vector.load %arg3[%c0_2, %c0_3, %c0_4] : memref<2x32x16xf32, #tpu.memory_space<vmem>>, vector<1x32x16xf32>
    %4 = vector.shape_cast %3 : vector<1x32x16xf32> to vector<32x16xf32>
    %cst = arith.constant dense<0.000000e+00> : vector<32x128xf32>
    %5 = tpu.matmul %4, %2, %cst {dimension_numbers = #tpu.dot_dimension_numbers<[1], [0], [0], [1], [0, 0, 1, 1], [], []>} : vector<32x16xf32>, vector<16x128xf32>, vector<32x128xf32> -> vector<32x128xf32>
    %c0_5 = arith.constant 0 : index
    %c0_6 = arith.constant 0 : index
    %c0_7 = arith.constant 0 : index
    %6 = vector.load %arg2[%c0_5, %c0_6, %c0_7] : memref<1x32x1xf32, #tpu.memory_space<vmem>>, vector<1x32x1xf32>
    %7 = vector.shape_cast %6 : vector<1x32x1xf32> to vector<32x1xf32>
    %8 = vector.broadcast %7 : vector<32x1xf32> to vector<32x128xf32>
    %9 = arith.addf %5, %8 : vector<32x128xf32>
    %c0_8 = arith.constant 0 : index
    %c0_9 = arith.constant 0 : index
    %c0_10 = arith.constant 0 : index
    %10 = vector.load %arg7[%c0_8, %c0_9, %c0_10] : memref<3x32x6xf32, #tpu.memory_space<vmem>>, vector<1x32x6xf32>
    %11 = vector.shape_cast %10 : vector<1x32x6xf32> to vector<32x6xf32>
    %c0_11 = arith.constant 0 : index
    %c0_12 = arith.constant 0 : index
    %12 = memref.load %arg9[%c0_11, %c0_12] : memref<3x2xf32, #tpu.memory_space<smem>>
    %cst_13 = arith.constant 0.000000e+00 : f32
    %13 = vector.broadcast %cst_13 : f32 to vector<32x128xf32>
    %14 = arith.cmpf oge, %9, %13 : vector<32x128xf32>
    %15 = vector.broadcast %12 : f32 to vector<32x128xf32>
    %16 = arith.mulf %15, %9 : vector<32x128xf32>
    %17 = arith.select %14, %9, %16 : vector<32x128xi1>, vector<32x128xf32>
    %18 = vector.extract_strided_slice %11 {offsets = [0, 1], sizes = [32, 1], strides = [1, 1]} : vector<32x6xf32> to vector<32x1xf32>
    %19 = vector.extract_strided_slice %11 {offsets = [0, 2], sizes = [32, 1], strides = [1, 1]} : vector<32x6xf32> to vector<32x1xf32>
    %cst_14 = arith.constant dense<0.000000e+00> : vector<128xf32>
    %20 = vector.multi_reduction <add>, %17, %cst_14 [0] : vector<32x128xf32> to vector<128xf32>
    %21 = vector.shape_cast %20 : vector<128xf32> to vector<1x128xf32>
    %22 = arith.mulf %17, %17 : vector<32x128xf32>
    %cst_15 = arith.constant dense<0.000000e+00> : vector<128xf32>
    %23 = vector.multi_reduction <add>, %22, %cst_15 [0] : vector<32x128xf32> to vector<128xf32>
    %24 = vector.shape_cast %23 : vector<128xf32> to vector<1x128xf32>
    %25 = vector.shape_cast %21 : vector<1x128xf32> to vector<1x1x128xf32>
    %cst_16 = arith.constant dense<0.000000e+00> : vector<1xf32>
    %26 = vector.multi_reduction <add>, %25, %cst_16 [1, 2] : vector<1x1x128xf32> to vector<1xf32>
    %27 = vector.shape_cast %26 : vector<1xf32> to vector<1x1x1xf32>
    %28 = vector.extract %27[0, 0, 0] : f32 from vector<1x1x1xf32>
    %29 = vector.broadcast %28 : f32 to vector<1x1xf32>
    %30 = vector.shape_cast %24 : vector<1x128xf32> to vector<1x1x128xf32>
    %cst_17 = arith.constant dense<0.000000e+00> : vector<1xf32>
    %31 = vector.multi_reduction <add>, %30, %cst_17 [1, 2] : vector<1x1x128xf32> to vector<1xf32>
    %32 = vector.shape_cast %31 : vector<1xf32> to vector<1x1x1xf32>
    %33 = vector.extract %32[0, 0, 0] : f32 from vector<1x1x1xf32>
    %34 = vector.broadcast %33 : f32 to vector<1x1xf32>
    %cst_18 = arith.constant 4.096000e+03 : f32
    %35 = vector.broadcast %cst_18 : f32 to vector<1x1xf32>
    %36 = arith.divf %29, %35 : vector<1x1xf32>
    %cst_19 = arith.constant 4.096000e+03 : f32
    %37 = vector.broadcast %cst_19 : f32 to vector<1x1xf32>
    %38 = arith.divf %34, %37 : vector<1x1xf32>
    %39 = arith.mulf %36, %36 : vector<1x1xf32>
    %40 = arith.subf %38, %39 : vector<1x1xf32>
    %cst_20 = arith.constant 0.000000e+00 : f32
    %41 = vector.broadcast %cst_20 : f32 to vector<1x1xf32>
    %42 = arith.maximumf %40, %41 : vector<1x1xf32>
    %cst_21 = arith.constant 9.99999997E-7 : f32
    %43 = vector.broadcast %cst_21 : f32 to vector<1x1xf32>
    %44 = arith.addf %42, %43 : vector<1x1xf32>
    %45 = math.rsqrt %44 : vector<1x1xf32>
    %46 = vector.broadcast %45 : vector<1x1xf32> to vector<32x1xf32>
    %47 = arith.mulf %18, %46 : vector<32x1xf32>
    %48 = vector.broadcast %36 : vector<1x1xf32> to vector<32x1xf32>
    %49 = arith.mulf %47, %48 : vector<32x1xf32>
    %50 = arith.subf %19, %49 : vector<32x1xf32>
    %51 = vector.broadcast %47 : vector<32x1xf32> to vector<32x128xf32>
    %52 = arith.mulf %17, %51 : vector<32x128xf32>
    %53 = vector.broadcast %50 : vector<32x1xf32> to vector<32x128xf32>
    %54 = arith.addf %52, %53 : vector<32x128xf32>
    %c0_22 = arith.constant 0 : index
    %c0_23 = arith.constant 0 : index
    %c0_24 = arith.constant 0 : index
    %55 = vector.load %arg8[%c0_22, %c0_23, %c0_24] : memref<3x32x3xf32, #tpu.memory_space<vmem>>, vector<1x32x3xf32>
    %56 = vector.shape_cast %55 : vector<1x32x3xf32> to vector<32x3xf32>
    %57 = vector.extract_strided_slice %56 {offsets = [0, 1], sizes = [32, 1], strides = [1, 1]} : vector<32x3xf32> to vector<32x1xf32>
    %58 = vector.broadcast %57 : vector<32x1xf32> to vector<32x128xf32>
    %59 = arith.mulf %54, %58 : vector<32x128xf32>
    %60 = vector.extract_strided_slice %11 {offsets = [0, 3], sizes = [32, 1], strides = [1, 1]} : vector<32x6xf32> to vector<32x1xf32>
    %61 = vector.broadcast %60 : vector<32x1xf32> to vector<32x128xf32>
    %62 = arith.addf %59, %61 : vector<32x128xf32>
    %c1_i32 = arith.constant 1 : i32
    %63 = tpu.dynamic_rotate %54 by %c1_i32 dim 1 : vector<32x128xf32>, i32 -> vector<32x128xf32>
    %c-1_i32 = arith.constant -1 : i32
    %64 = vector.broadcast %c-1_i32 : i32 to vector<1x128xi32>
    %65 = arith.addi %0, %64 : vector<1x128xi32>
    %c0_i32 = arith.constant 0 : i32
    %66 = vector.broadcast %c0_i32 : i32 to vector<1x128xi32>
    %67 = arith.cmpi sge, %65, %66 : vector<1x128xi32>
    %c-1_i32_25 = arith.constant -1 : i32
    %68 = vector.broadcast %c-1_i32_25 : i32 to vector<1x128xi32>
    %69 = arith.addi %0, %68 : vector<1x128xi32>
    %c128_i32 = arith.constant 128 : i32
    %70 = vector.broadcast %c128_i32 : i32 to vector<1x128xi32>
    %71 = arith.cmpi slt, %69, %70 : vector<1x128xi32>
    %72 = arith.andi %67, %71 : vector<1x128xi1>
    %cst_26 = arith.constant 0.000000e+00 : f32
    %73 = vector.shape_cast %72 : vector<1x128xi1> to vector<1x128xi1>
    %74 = vector.broadcast %73 : vector<1x128xi1> to vector<32x128xi1>
    %75 = vector.broadcast %cst_26 : f32 to vector<32x128xf32>
    %76 = arith.select %74, %63, %75 : vector<32x128xi1>, vector<32x128xf32>
    %77 = vector.extract_strided_slice %56 {offsets = [0, 0], sizes = [32, 1], strides = [1, 1]} : vector<32x3xf32> to vector<32x1xf32>
    %78 = vector.broadcast %77 : vector<32x1xf32> to vector<32x128xf32>
    %79 = arith.mulf %76, %78 : vector<32x128xf32>
    %80 = arith.addf %62, %79 : vector<32x128xf32>
    %c127_i32 = arith.constant 127 : i32
    %81 = tpu.dynamic_rotate %54 by %c127_i32 dim 1 : vector<32x128xf32>, i32 -> vector<32x128xf32>
    %c1_i32_27 = arith.constant 1 : i32
    %82 = vector.broadcast %c1_i32_27 : i32 to vector<1x128xi32>
    %83 = arith.addi %0, %82 : vector<1x128xi32>
    %c0_i32_28 = arith.constant 0 : i32
    %84 = vector.broadcast %c0_i32_28 : i32 to vector<1x128xi32>
    %85 = arith.cmpi sge, %83, %84 : vector<1x128xi32>
    %c1_i32_29 = arith.constant 1 : i32
    %86 = vector.broadcast %c1_i32_29 : i32 to vector<1x128xi32>
    %87 = arith.addi %0, %86 : vector<1x128xi32>
    %c128_i32_30 = arith.constant 128 : i32
    %88 = vector.broadcast %c128_i32_30 : i32 to vector<1x128xi32>
    %89 = arith.cmpi slt, %87, %88 : vector<1x128xi32>
    %90 = arith.andi %85, %89 : vector<1x128xi1>
    %cst_31 = arith.constant 0.000000e+00 : f32
    %91 = vector.shape_cast %90 : vector<1x128xi1> to vector<1x128xi1>
    %92 = vector.broadcast %91 : vector<1x128xi1> to vector<32x128xi1>
    %93 = vector.broadcast %cst_31 : f32 to vector<32x128xf32>
    %94 = arith.select %92, %81, %93 : vector<32x128xi1>, vector<32x128xf32>
    %95 = vector.extract_strided_slice %56 {offsets = [0, 2], sizes = [32, 1], strides = [1, 1]} : vector<32x3xf32> to vector<32x1xf32>
    %96 = vector.broadcast %95 : vector<32x1xf32> to vector<32x128xf32>
    %97 = arith.mulf %94, %96 : vector<32x128xf32>
    %98 = arith.addf %80, %97 : vector<32x128xf32>
    %c0_32 = arith.constant 0 : index
    %c1 = arith.constant 1 : index
    %99 = memref.load %arg9[%c0_32, %c1] : memref<3x2xf32, #tpu.memory_space<smem>>
    %cst_33 = arith.constant 0.000000e+00 : f32
    %100 = vector.broadcast %cst_33 : f32 to vector<32x128xf32>
    %101 = arith.cmpf oge, %98, %100 : vector<32x128xf32>
    %102 = vector.broadcast %99 : f32 to vector<32x128xf32>
    %103 = arith.mulf %102, %98 : vector<32x128xf32>
    %104 = arith.select %101, %98, %103 : vector<32x128xi1>, vector<32x128xf32>
    %105 = vector.extract_strided_slice %11 {offsets = [0, 4], sizes = [32, 1], strides = [1, 1]} : vector<32x6xf32> to vector<32x1xf32>
    %106 = vector.extract_strided_slice %11 {offsets = [0, 5], sizes = [32, 1], strides = [1, 1]} : vector<32x6xf32> to vector<32x1xf32>
    %cst_34 = arith.constant dense<0.000000e+00> : vector<128xf32>
    %107 = vector.multi_reduction <add>, %104, %cst_34 [0] : vector<32x128xf32> to vector<128xf32>
    %108 = vector.shape_cast %107 : vector<128xf32> to vector<1x128xf32>
    %109 = arith.mulf %104, %104 : vector<32x128xf32>
    %cst_35 = arith.constant dense<0.000000e+00> : vector<128xf32>
    %110 = vector.multi_reduction <add>, %109, %cst_35 [0] : vector<32x128xf32> to vector<128xf32>
    %111 = vector.shape_cast %110 : vector<128xf32> to vector<1x128xf32>
    %112 = vector.shape_cast %108 : vector<1x128xf32> to vector<1x1x128xf32>
    %cst_36 = arith.constant dense<0.000000e+00> : vector<1xf32>
    %113 = vector.multi_reduction <add>, %112, %cst_36 [1, 2] : vector<1x1x128xf32> to vector<1xf32>
    %114 = vector.shape_cast %113 : vector<1xf32> to vector<1x1x1xf32>
    %115 = vector.extract %114[0, 0, 0] : f32 from vector<1x1x1xf32>
    %116 = vector.broadcast %115 : f32 to vector<1x1xf32>
    %117 = vector.shape_cast %111 : vector<1x128xf32> to vector<1x1x128xf32>
    %cst_37 = arith.constant dense<0.000000e+00> : vector<1xf32>
    %118 = vector.multi_reduction <add>, %117, %cst_37 [1, 2] : vector<1x1x128xf32> to vector<1xf32>
    %119 = vector.shape_cast %118 : vector<1xf32> to vector<1x1x1xf32>
    %120 = vector.extract %119[0, 0, 0] : f32 from vector<1x1x1xf32>
    %121 = vector.broadcast %120 : f32 to vector<1x1xf32>
    %cst_38 = arith.constant 4.096000e+03 : f32
    %122 = vector.broadcast %cst_38 : f32 to vector<1x1xf32>
    %123 = arith.divf %116, %122 : vector<1x1xf32>
    %cst_39 = arith.constant 4.096000e+03 : f32
    %124 = vector.broadcast %cst_39 : f32 to vector<1x1xf32>
    %125 = arith.divf %121, %124 : vector<1x1xf32>
    %126 = arith.mulf %123, %123 : vector<1x1xf32>
    %127 = arith.subf %125, %126 : vector<1x1xf32>
    %cst_40 = arith.constant 0.000000e+00 : f32
    %128 = vector.broadcast %cst_40 : f32 to vector<1x1xf32>
    %129 = arith.maximumf %127, %128 : vector<1x1xf32>
    %cst_41 = arith.constant 9.99999997E-7 : f32
    %130 = vector.broadcast %cst_41 : f32 to vector<1x1xf32>
    %131 = arith.addf %129, %130 : vector<1x1xf32>
    %132 = math.rsqrt %131 : vector<1x1xf32>
    %133 = vector.broadcast %132 : vector<1x1xf32> to vector<32x1xf32>
    %134 = arith.mulf %105, %133 : vector<32x1xf32>
    %135 = vector.broadcast %123 : vector<1x1xf32> to vector<32x1xf32>
    %136 = arith.mulf %134, %135 : vector<32x1xf32>
    %137 = arith.subf %106, %136 : vector<32x1xf32>
    %138 = vector.broadcast %134 : vector<32x1xf32> to vector<32x128xf32>
    %139 = arith.mulf %104, %138 : vector<32x128xf32>
    %140 = vector.broadcast %137 : vector<32x1xf32> to vector<32x128xf32>
    %141 = arith.addf %139, %140 : vector<32x128xf32>
    %c0_42 = arith.constant 0 : index
    %c0_43 = arith.constant 0 : index
    %c0_44 = arith.constant 0 : index
    %142 = vector.load %arg5[%c0_42, %c0_43, %c0_44] : memref<2x16x32xf32, #tpu.memory_space<vmem>>, vector<1x16x32xf32>
    %143 = vector.shape_cast %142 : vector<1x16x32xf32> to vector<16x32xf32>
    %cst_45 = arith.constant dense<0.000000e+00> : vector<16x128xf32>
    %144 = tpu.matmul %143, %141, %cst_45 {dimension_numbers = #tpu.dot_dimension_numbers<[1], [0], [0], [1], [0, 0, 1, 1], [], []>} : vector<16x32xf32>, vector<32x128xf32>, vector<16x128xf32> -> vector<16x128xf32>
    %c0_46 = arith.constant 0 : index
    %c0_47 = arith.constant 0 : index
    %c0_48 = arith.constant 0 : index
    %145 = vector.load %arg6[%c0_46, %c0_47, %c0_48] : memref<2x16x1xf32, #tpu.memory_space<vmem>>, vector<1x16x1xf32>
    %146 = vector.shape_cast %145 : vector<1x16x1xf32> to vector<16x1xf32>
    %147 = vector.broadcast %146 : vector<16x1xf32> to vector<16x128xf32>
    %148 = arith.addf %144, %147 : vector<16x128xf32>
    %149 = arith.addf %148, %2 : vector<16x128xf32>
    %c1_49 = arith.constant 1 : index
    %c0_50 = arith.constant 0 : index
    %c0_51 = arith.constant 0 : index
    %150 = vector.load %arg3[%c1_49, %c0_50, %c0_51] : memref<2x32x16xf32, #tpu.memory_space<vmem>>, vector<1x32x16xf32>
    %151 = vector.shape_cast %150 : vector<1x32x16xf32> to vector<32x16xf32>
    %cst_52 = arith.constant dense<0.000000e+00> : vector<32x128xf32>
    %152 = tpu.matmul %151, %149, %cst_52 {dimension_numbers = #tpu.dot_dimension_numbers<[1], [0], [0], [1], [0, 0, 1, 1], [], []>} : vector<32x16xf32>, vector<16x128xf32>, vector<32x128xf32> -> vector<32x128xf32>
    %c1_53 = arith.constant 1 : index
    %c0_54 = arith.constant 0 : index
    %c0_55 = arith.constant 0 : index
    %153 = vector.load %arg7[%c1_53, %c0_54, %c0_55] : memref<3x32x6xf32, #tpu.memory_space<vmem>>, vector<1x32x6xf32>
    %154 = vector.shape_cast %153 : vector<1x32x6xf32> to vector<32x6xf32>
    %155 = vector.extract_strided_slice %154 {offsets = [0, 0], sizes = [32, 1], strides = [1, 1]} : vector<32x6xf32> to vector<32x1xf32>
    %156 = vector.broadcast %155 : vector<32x1xf32> to vector<32x128xf32>
    %157 = arith.addf %152, %156 : vector<32x128xf32>
    %c1_56 = arith.constant 1 : index
    %c0_57 = arith.constant 0 : index
    %c0_58 = arith.constant 0 : index
    %158 = vector.load %arg7[%c1_56, %c0_57, %c0_58] : memref<3x32x6xf32, #tpu.memory_space<vmem>>, vector<1x32x6xf32>
    %159 = vector.shape_cast %158 : vector<1x32x6xf32> to vector<32x6xf32>
    %c1_59 = arith.constant 1 : index
    %c0_60 = arith.constant 0 : index
    %160 = memref.load %arg9[%c1_59, %c0_60] : memref<3x2xf32, #tpu.memory_space<smem>>
    %cst_61 = arith.constant 0.000000e+00 : f32
    %161 = vector.broadcast %cst_61 : f32 to vector<32x128xf32>
    %162 = arith.cmpf oge, %157, %161 : vector<32x128xf32>
    %163 = vector.broadcast %160 : f32 to vector<32x128xf32>
    %164 = arith.mulf %163, %157 : vector<32x128xf32>
    %165 = arith.select %162, %157, %164 : vector<32x128xi1>, vector<32x128xf32>
    %166 = vector.extract_strided_slice %159 {offsets = [0, 1], sizes = [32, 1], strides = [1, 1]} : vector<32x6xf32> to vector<32x1xf32>
    %167 = vector.extract_strided_slice %159 {offsets = [0, 2], sizes = [32, 1], strides = [1, 1]} : vector<32x6xf32> to vector<32x1xf32>
    %cst_62 = arith.constant dense<0.000000e+00> : vector<128xf32>
    %168 = vector.multi_reduction <add>, %165, %cst_62 [0] : vector<32x128xf32> to vector<128xf32>
    %169 = vector.shape_cast %168 : vector<128xf32> to vector<1x128xf32>
    %170 = arith.mulf %165, %165 : vector<32x128xf32>
    %cst_63 = arith.constant dense<0.000000e+00> : vector<128xf32>
    %171 = vector.multi_reduction <add>, %170, %cst_63 [0] : vector<32x128xf32> to vector<128xf32>
    %172 = vector.shape_cast %171 : vector<128xf32> to vector<1x128xf32>
    %173 = vector.shape_cast %169 : vector<1x128xf32> to vector<1x1x128xf32>
    %cst_64 = arith.constant dense<0.000000e+00> : vector<1xf32>
    %174 = vector.multi_reduction <add>, %173, %cst_64 [1, 2] : vector<1x1x128xf32> to vector<1xf32>
    %175 = vector.shape_cast %174 : vector<1xf32> to vector<1x1x1xf32>
    %176 = vector.extract %175[0, 0, 0] : f32 from vector<1x1x1xf32>
    %177 = vector.broadcast %176 : f32 to vector<1x1xf32>
    %178 = vector.shape_cast %172 : vector<1x128xf32> to vector<1x1x128xf32>
    %cst_65 = arith.constant dense<0.000000e+00> : vector<1xf32>
    %179 = vector.multi_reduction <add>, %178, %cst_65 [1, 2] : vector<1x1x128xf32> to vector<1xf32>
    %180 = vector.shape_cast %179 : vector<1xf32> to vector<1x1x1xf32>
    %181 = vector.extract %180[0, 0, 0] : f32 from vector<1x1x1xf32>
    %182 = vector.broadcast %181 : f32 to vector<1x1xf32>
    %cst_66 = arith.constant 4.096000e+03 : f32
    %183 = vector.broadcast %cst_66 : f32 to vector<1x1xf32>
    %184 = arith.divf %177, %183 : vector<1x1xf32>
    %cst_67 = arith.constant 4.096000e+03 : f32
    %185 = vector.broadcast %cst_67 : f32 to vector<1x1xf32>
    %186 = arith.divf %182, %185 : vector<1x1xf32>
    %187 = arith.mulf %184, %184 : vector<1x1xf32>
    %188 = arith.subf %186, %187 : vector<1x1xf32>
    %cst_68 = arith.constant 0.000000e+00 : f32
    %189 = vector.broadcast %cst_68 : f32 to vector<1x1xf32>
    %190 = arith.maximumf %188, %189 : vector<1x1xf32>
    %cst_69 = arith.constant 9.99999997E-7 : f32
    %191 = vector.broadcast %cst_69 : f32 to vector<1x1xf32>
    %192 = arith.addf %190, %191 : vector<1x1xf32>
    %193 = math.rsqrt %192 : vector<1x1xf32>
    %194 = vector.broadcast %193 : vector<1x1xf32> to vector<32x1xf32>
    %195 = arith.mulf %166, %194 : vector<32x1xf32>
    %196 = vector.broadcast %184 : vector<1x1xf32> to vector<32x1xf32>
    %197 = arith.mulf %195, %196 : vector<32x1xf32>
    %198 = arith.subf %167, %197 : vector<32x1xf32>
    %199 = vector.broadcast %195 : vector<32x1xf32> to vector<32x128xf32>
    %200 = arith.mulf %165, %199 : vector<32x128xf32>
    %201 = vector.broadcast %198 : vector<32x1xf32> to vector<32x128xf32>
    %202 = arith.addf %200, %201 : vector<32x128xf32>
    %c1_70 = arith.constant 1 : index
    %c0_71 = arith.constant 0 : index
    %c0_72 = arith.constant 0 : index
    %203 = vector.load %arg8[%c1_70, %c0_71, %c0_72] : memref<3x32x3xf32, #tpu.memory_space<vmem>>, vector<1x32x3xf32>
    %204 = vector.shape_cast %203 : vector<1x32x3xf32> to vector<32x3xf32>
    %205 = vector.extract_strided_slice %204 {offsets = [0, 1], sizes = [32, 1], strides = [1, 1]} : vector<32x3xf32> to vector<32x1xf32>
    %206 = vector.broadcast %205 : vector<32x1xf32> to vector<32x128xf32>
    %207 = arith.mulf %202, %206 : vector<32x128xf32>
    %208 = vector.extract_strided_slice %159 {offsets = [0, 3], sizes = [32, 1], strides = [1, 1]} : vector<32x6xf32> to vector<32x1xf32>
    %209 = vector.broadcast %208 : vector<32x1xf32> to vector<32x128xf32>
    %210 = arith.addf %207, %209 : vector<32x128xf32>
    %c2_i32 = arith.constant 2 : i32
    %211 = tpu.dynamic_rotate %202 by %c2_i32 dim 1 : vector<32x128xf32>, i32 -> vector<32x128xf32>
    %c-2_i32 = arith.constant -2 : i32
    %212 = vector.broadcast %c-2_i32 : i32 to vector<1x128xi32>
    %213 = arith.addi %0, %212 : vector<1x128xi32>
    %c0_i32_73 = arith.constant 0 : i32
    %214 = vector.broadcast %c0_i32_73 : i32 to vector<1x128xi32>
    %215 = arith.cmpi sge, %213, %214 : vector<1x128xi32>
    %c-2_i32_74 = arith.constant -2 : i32
    %216 = vector.broadcast %c-2_i32_74 : i32 to vector<1x128xi32>
    %217 = arith.addi %0, %216 : vector<1x128xi32>
    %c128_i32_75 = arith.constant 128 : i32
    %218 = vector.broadcast %c128_i32_75 : i32 to vector<1x128xi32>
    %219 = arith.cmpi slt, %217, %218 : vector<1x128xi32>
    %220 = arith.andi %215, %219 : vector<1x128xi1>
    %cst_76 = arith.constant 0.000000e+00 : f32
    %221 = vector.shape_cast %220 : vector<1x128xi1> to vector<1x128xi1>
    %222 = vector.broadcast %221 : vector<1x128xi1> to vector<32x128xi1>
    %223 = vector.broadcast %cst_76 : f32 to vector<32x128xf32>
    %224 = arith.select %222, %211, %223 : vector<32x128xi1>, vector<32x128xf32>
    %225 = vector.extract_strided_slice %204 {offsets = [0, 0], sizes = [32, 1], strides = [1, 1]} : vector<32x3xf32> to vector<32x1xf32>
    %226 = vector.broadcast %225 : vector<32x1xf32> to vector<32x128xf32>
    %227 = arith.mulf %224, %226 : vector<32x128xf32>
    %228 = arith.addf %210, %227 : vector<32x128xf32>
    %c126_i32 = arith.constant 126 : i32
    %229 = tpu.dynamic_rotate %202 by %c126_i32 dim 1 : vector<32x128xf32>, i32 -> vector<32x128xf32>
    %c2_i32_77 = arith.constant 2 : i32
    %230 = vector.broadcast %c2_i32_77 : i32 to vector<1x128xi32>
    %231 = arith.addi %0, %230 : vector<1x128xi32>
    %c0_i32_78 = arith.constant 0 : i32
    %232 = vector.broadcast %c0_i32_78 : i32 to vector<1x128xi32>
    %233 = arith.cmpi sge, %231, %232 : vector<1x128xi32>
    %c2_i32_79 = arith.constant 2 : i32
    %234 = vector.broadcast %c2_i32_79 : i32 to vector<1x128xi32>
    %235 = arith.addi %0, %234 : vector<1x128xi32>
    %c128_i32_80 = arith.constant 128 : i32
    %236 = vector.broadcast %c128_i32_80 : i32 to vector<1x128xi32>
    %237 = arith.cmpi slt, %235, %236 : vector<1x128xi32>
    %238 = arith.andi %233, %237 : vector<1x128xi1>
    %cst_81 = arith.constant 0.000000e+00 : f32
    %239 = vector.shape_cast %238 : vector<1x128xi1> to vector<1x128xi1>
    %240 = vector.broadcast %239 : vector<1x128xi1> to vector<32x128xi1>
    %241 = vector.broadcast %cst_81 : f32 to vector<32x128xf32>
    %242 = arith.select %240, %229, %241 : vector<32x128xi1>, vector<32x128xf32>
    %243 = vector.extract_strided_slice %204 {offsets = [0, 2], sizes = [32, 1], strides = [1, 1]} : vector<32x3xf32> to vector<32x1xf32>
    %244 = vector.broadcast %243 : vector<32x1xf32> to vector<32x128xf32>
    %245 = arith.mulf %242, %244 : vector<32x128xf32>
    %246 = arith.addf %228, %245 : vector<32x128xf32>
    %c1_82 = arith.constant 1 : index
    %c1_83 = arith.constant 1 : index
    %247 = memref.load %arg9[%c1_82, %c1_83] : memref<3x2xf32, #tpu.memory_space<smem>>
    %cst_84 = arith.constant 0.000000e+00 : f32
    %248 = vector.broadcast %cst_84 : f32 to vector<32x128xf32>
    %249 = arith.cmpf oge, %246, %248 : vector<32x128xf32>
    %250 = vector.broadcast %247 : f32 to vector<32x128xf32>
    %251 = arith.mulf %250, %246 : vector<32x128xf32>
    %252 = arith.select %249, %246, %251 : vector<32x128xi1>, vector<32x128xf32>
    %253 = vector.extract_strided_slice %159 {offsets = [0, 4], sizes = [32, 1], strides = [1, 1]} : vector<32x6xf32> to vector<32x1xf32>
    %254 = vector.extract_strided_slice %159 {offsets = [0, 5], sizes = [32, 1], strides = [1, 1]} : vector<32x6xf32> to vector<32x1xf32>
    %cst_85 = arith.constant dense<0.000000e+00> : vector<128xf32>
    %255 = vector.multi_reduction <add>, %252, %cst_85 [0] : vector<32x128xf32> to vector<128xf32>
    %256 = vector.shape_cast %255 : vector<128xf32> to vector<1x128xf32>
    %257 = arith.mulf %252, %252 : vector<32x128xf32>
    %cst_86 = arith.constant dense<0.000000e+00> : vector<128xf32>
    %258 = vector.multi_reduction <add>, %257, %cst_86 [0] : vector<32x128xf32> to vector<128xf32>
    %259 = vector.shape_cast %258 : vector<128xf32> to vector<1x128xf32>
    %260 = vector.shape_cast %256 : vector<1x128xf32> to vector<1x1x128xf32>
    %cst_87 = arith.constant dense<0.000000e+00> : vector<1xf32>
    %261 = vector.multi_reduction <add>, %260, %cst_87 [1, 2] : vector<1x1x128xf32> to vector<1xf32>
    %262 = vector.shape_cast %261 : vector<1xf32> to vector<1x1x1xf32>
    %263 = vector.extract %262[0, 0, 0] : f32 from vector<1x1x1xf32>
    %264 = vector.broadcast %263 : f32 to vector<1x1xf32>
    %265 = vector.shape_cast %259 : vector<1x128xf32> to vector<1x1x128xf32>
    %cst_88 = arith.constant dense<0.000000e+00> : vector<1xf32>
    %266 = vector.multi_reduction <add>, %265, %cst_88 [1, 2] : vector<1x1x128xf32> to vector<1xf32>
    %267 = vector.shape_cast %266 : vector<1xf32> to vector<1x1x1xf32>
    %268 = vector.extract %267[0, 0, 0] : f32 from vector<1x1x1xf32>
    %269 = vector.broadcast %268 : f32 to vector<1x1xf32>
    %cst_89 = arith.constant 4.096000e+03 : f32
    %270 = vector.broadcast %cst_89 : f32 to vector<1x1xf32>
    %271 = arith.divf %264, %270 : vector<1x1xf32>
    %cst_90 = arith.constant 4.096000e+03 : f32
    %272 = vector.broadcast %cst_90 : f32 to vector<1x1xf32>
    %273 = arith.divf %269, %272 : vector<1x1xf32>
    %274 = arith.mulf %271, %271 : vector<1x1xf32>
    %275 = arith.subf %273, %274 : vector<1x1xf32>
    %cst_91 = arith.constant 0.000000e+00 : f32
    %276 = vector.broadcast %cst_91 : f32 to vector<1x1xf32>
    %277 = arith.maximumf %275, %276 : vector<1x1xf32>
    %cst_92 = arith.constant 9.99999997E-7 : f32
    %278 = vector.broadcast %cst_92 : f32 to vector<1x1xf32>
    %279 = arith.addf %277, %278 : vector<1x1xf32>
    %280 = math.rsqrt %279 : vector<1x1xf32>
    %281 = vector.broadcast %280 : vector<1x1xf32> to vector<32x1xf32>
    %282 = arith.mulf %253, %281 : vector<32x1xf32>
    %283 = vector.broadcast %271 : vector<1x1xf32> to vector<32x1xf32>
    %284 = arith.mulf %282, %283 : vector<32x1xf32>
    %285 = arith.subf %254, %284 : vector<32x1xf32>
    %286 = vector.broadcast %282 : vector<32x1xf32> to vector<32x128xf32>
    %287 = arith.mulf %252, %286 : vector<32x128xf32>
    %288 = vector.broadcast %285 : vector<32x1xf32> to vector<32x128xf32>
    %289 = arith.addf %287, %288 : vector<32x128xf32>
    %c1_93 = arith.constant 1 : index
    %c0_94 = arith.constant 0 : index
    %c0_95 = arith.constant 0 : index
    %290 = vector.load %arg4[%c1_93, %c0_94, %c0_95] : memref<3x32x32xf32, #tpu.memory_space<vmem>>, vector<1x32x32xf32>
    %291 = vector.shape_cast %290 : vector<1x32x32xf32> to vector<32x32xf32>
    %cst_96 = arith.constant dense<0.000000e+00> : vector<32x128xf32>
    %292 = tpu.matmul %291, %289, %cst_96 {dimension_numbers = #tpu.dot_dimension_numbers<[1], [0], [0], [1], [0, 0, 1, 1], [], []>} : vector<32x32xf32>, vector<32x128xf32>, vector<32x128xf32> -> vector<32x128xf32>
    %c2 = arith.constant 2 : index
    %c0_97 = arith.constant 0 : index
    %c0_98 = arith.constant 0 : index
    %293 = vector.load %arg7[%c2, %c0_97, %c0_98] : memref<3x32x6xf32, #tpu.memory_space<vmem>>, vector<1x32x6xf32>
    %294 = vector.shape_cast %293 : vector<1x32x6xf32> to vector<32x6xf32>
    %295 = vector.extract_strided_slice %294 {offsets = [0, 0], sizes = [32, 1], strides = [1, 1]} : vector<32x6xf32> to vector<32x1xf32>
    %296 = vector.broadcast %295 : vector<32x1xf32> to vector<32x128xf32>
    %297 = arith.addf %292, %296 : vector<32x128xf32>
    %c2_99 = arith.constant 2 : index
    %c0_100 = arith.constant 0 : index
    %c0_101 = arith.constant 0 : index
    %298 = vector.load %arg7[%c2_99, %c0_100, %c0_101] : memref<3x32x6xf32, #tpu.memory_space<vmem>>, vector<1x32x6xf32>
    %299 = vector.shape_cast %298 : vector<1x32x6xf32> to vector<32x6xf32>
    %c2_102 = arith.constant 2 : index
    %c0_103 = arith.constant 0 : index
    %300 = memref.load %arg9[%c2_102, %c0_103] : memref<3x2xf32, #tpu.memory_space<smem>>
    %cst_104 = arith.constant 0.000000e+00 : f32
    %301 = vector.broadcast %cst_104 : f32 to vector<32x128xf32>
    %302 = arith.cmpf oge, %297, %301 : vector<32x128xf32>
    %303 = vector.broadcast %300 : f32 to vector<32x128xf32>
    %304 = arith.mulf %303, %297 : vector<32x128xf32>
    %305 = arith.select %302, %297, %304 : vector<32x128xi1>, vector<32x128xf32>
    %306 = vector.extract_strided_slice %299 {offsets = [0, 1], sizes = [32, 1], strides = [1, 1]} : vector<32x6xf32> to vector<32x1xf32>
    %307 = vector.extract_strided_slice %299 {offsets = [0, 2], sizes = [32, 1], strides = [1, 1]} : vector<32x6xf32> to vector<32x1xf32>
    %cst_105 = arith.constant dense<0.000000e+00> : vector<128xf32>
    %308 = vector.multi_reduction <add>, %305, %cst_105 [0] : vector<32x128xf32> to vector<128xf32>
    %309 = vector.shape_cast %308 : vector<128xf32> to vector<1x128xf32>
    %310 = arith.mulf %305, %305 : vector<32x128xf32>
    %cst_106 = arith.constant dense<0.000000e+00> : vector<128xf32>
    %311 = vector.multi_reduction <add>, %310, %cst_106 [0] : vector<32x128xf32> to vector<128xf32>
    %312 = vector.shape_cast %311 : vector<128xf32> to vector<1x128xf32>
    %313 = vector.shape_cast %309 : vector<1x128xf32> to vector<1x1x128xf32>
    %cst_107 = arith.constant dense<0.000000e+00> : vector<1xf32>
    %314 = vector.multi_reduction <add>, %313, %cst_107 [1, 2] : vector<1x1x128xf32> to vector<1xf32>
    %315 = vector.shape_cast %314 : vector<1xf32> to vector<1x1x1xf32>
    %316 = vector.extract %315[0, 0, 0] : f32 from vector<1x1x1xf32>
    %317 = vector.broadcast %316 : f32 to vector<1x1xf32>
    %318 = vector.shape_cast %312 : vector<1x128xf32> to vector<1x1x128xf32>
    %cst_108 = arith.constant dense<0.000000e+00> : vector<1xf32>
    %319 = vector.multi_reduction <add>, %318, %cst_108 [1, 2] : vector<1x1x128xf32> to vector<1xf32>
    %320 = vector.shape_cast %319 : vector<1xf32> to vector<1x1x1xf32>
    %321 = vector.extract %320[0, 0, 0] : f32 from vector<1x1x1xf32>
    %322 = vector.broadcast %321 : f32 to vector<1x1xf32>
    %cst_109 = arith.constant 4.096000e+03 : f32
    %323 = vector.broadcast %cst_109 : f32 to vector<1x1xf32>
    %324 = arith.divf %317, %323 : vector<1x1xf32>
    %cst_110 = arith.constant 4.096000e+03 : f32
    %325 = vector.broadcast %cst_110 : f32 to vector<1x1xf32>
    %326 = arith.divf %322, %325 : vector<1x1xf32>
    %327 = arith.mulf %324, %324 : vector<1x1xf32>
    %328 = arith.subf %326, %327 : vector<1x1xf32>
    %cst_111 = arith.constant 0.000000e+00 : f32
    %329 = vector.broadcast %cst_111 : f32 to vector<1x1xf32>
    %330 = arith.maximumf %328, %329 : vector<1x1xf32>
    %cst_112 = arith.constant 9.99999997E-7 : f32
    %331 = vector.broadcast %cst_112 : f32 to vector<1x1xf32>
    %332 = arith.addf %330, %331 : vector<1x1xf32>
    %333 = math.rsqrt %332 : vector<1x1xf32>
    %334 = vector.broadcast %333 : vector<1x1xf32> to vector<32x1xf32>
    %335 = arith.mulf %306, %334 : vector<32x1xf32>
    %336 = vector.broadcast %324 : vector<1x1xf32> to vector<32x1xf32>
    %337 = arith.mulf %335, %336 : vector<32x1xf32>
    %338 = arith.subf %307, %337 : vector<32x1xf32>
    %339 = vector.broadcast %335 : vector<32x1xf32> to vector<32x128xf32>
    %340 = arith.mulf %305, %339 : vector<32x128xf32>
    %341 = vector.broadcast %338 : vector<32x1xf32> to vector<32x128xf32>
    %342 = arith.addf %340, %341 : vector<32x128xf32>
    %c2_113 = arith.constant 2 : index
    %c0_114 = arith.constant 0 : index
    %c0_115 = arith.constant 0 : index
    %343 = vector.load %arg8[%c2_113, %c0_114, %c0_115] : memref<3x32x3xf32, #tpu.memory_space<vmem>>, vector<1x32x3xf32>
    %344 = vector.shape_cast %343 : vector<1x32x3xf32> to vector<32x3xf32>
    %345 = vector.extract_strided_slice %344 {offsets = [0, 1], sizes = [32, 1], strides = [1, 1]} : vector<32x3xf32> to vector<32x1xf32>
    %346 = vector.broadcast %345 : vector<32x1xf32> to vector<32x128xf32>
    %347 = arith.mulf %342, %346 : vector<32x128xf32>
    %348 = vector.extract_strided_slice %299 {offsets = [0, 3], sizes = [32, 1], strides = [1, 1]} : vector<32x6xf32> to vector<32x1xf32>
    %349 = vector.broadcast %348 : vector<32x1xf32> to vector<32x128xf32>
    %350 = arith.addf %347, %349 : vector<32x128xf32>
    %c4_i32 = arith.constant 4 : i32
    %351 = tpu.dynamic_rotate %342 by %c4_i32 dim 1 : vector<32x128xf32>, i32 -> vector<32x128xf32>
    %c-4_i32 = arith.constant -4 : i32
    %352 = vector.broadcast %c-4_i32 : i32 to vector<1x128xi32>
    %353 = arith.addi %0, %352 : vector<1x128xi32>
    %c0_i32_116 = arith.constant 0 : i32
    %354 = vector.broadcast %c0_i32_116 : i32 to vector<1x128xi32>
    %355 = arith.cmpi sge, %353, %354 : vector<1x128xi32>
    %c-4_i32_117 = arith.constant -4 : i32
    %356 = vector.broadcast %c-4_i32_117 : i32 to vector<1x128xi32>
    %357 = arith.addi %0, %356 : vector<1x128xi32>
    %c128_i32_118 = arith.constant 128 : i32
    %358 = vector.broadcast %c128_i32_118 : i32 to vector<1x128xi32>
    %359 = arith.cmpi slt, %357, %358 : vector<1x128xi32>
    %360 = arith.andi %355, %359 : vector<1x128xi1>
    %cst_119 = arith.constant 0.000000e+00 : f32
    %361 = vector.shape_cast %360 : vector<1x128xi1> to vector<1x128xi1>
    %362 = vector.broadcast %361 : vector<1x128xi1> to vector<32x128xi1>
    %363 = vector.broadcast %cst_119 : f32 to vector<32x128xf32>
    %364 = arith.select %362, %351, %363 : vector<32x128xi1>, vector<32x128xf32>
    %365 = vector.extract_strided_slice %344 {offsets = [0, 0], sizes = [32, 1], strides = [1, 1]} : vector<32x3xf32> to vector<32x1xf32>
    %366 = vector.broadcast %365 : vector<32x1xf32> to vector<32x128xf32>
    %367 = arith.mulf %364, %366 : vector<32x128xf32>
    %368 = arith.addf %350, %367 : vector<32x128xf32>
    %c124_i32 = arith.constant 124 : i32
    %369 = tpu.dynamic_rotate %342 by %c124_i32 dim 1 : vector<32x128xf32>, i32 -> vector<32x128xf32>
    %c4_i32_120 = arith.constant 4 : i32
    %370 = vector.broadcast %c4_i32_120 : i32 to vector<1x128xi32>
    %371 = arith.addi %0, %370 : vector<1x128xi32>
    %c0_i32_121 = arith.constant 0 : i32
    %372 = vector.broadcast %c0_i32_121 : i32 to vector<1x128xi32>
    %373 = arith.cmpi sge, %371, %372 : vector<1x128xi32>
    %c4_i32_122 = arith.constant 4 : i32
    %374 = vector.broadcast %c4_i32_122 : i32 to vector<1x128xi32>
    %375 = arith.addi %0, %374 : vector<1x128xi32>
    %c128_i32_123 = arith.constant 128 : i32
    %376 = vector.broadcast %c128_i32_123 : i32 to vector<1x128xi32>
    %377 = arith.cmpi slt, %375, %376 : vector<1x128xi32>
    %378 = arith.andi %373, %377 : vector<1x128xi1>
    %cst_124 = arith.constant 0.000000e+00 : f32
    %379 = vector.shape_cast %378 : vector<1x128xi1> to vector<1x128xi1>
    %380 = vector.broadcast %379 : vector<1x128xi1> to vector<32x128xi1>
    %381 = vector.broadcast %cst_124 : f32 to vector<32x128xf32>
    %382 = arith.select %380, %369, %381 : vector<32x128xi1>, vector<32x128xf32>
    %383 = vector.extract_strided_slice %344 {offsets = [0, 2], sizes = [32, 1], strides = [1, 1]} : vector<32x3xf32> to vector<32x1xf32>
    %384 = vector.broadcast %383 : vector<32x1xf32> to vector<32x128xf32>
    %385 = arith.mulf %382, %384 : vector<32x128xf32>
    %386 = arith.addf %368, %385 : vector<32x128xf32>
    %c2_125 = arith.constant 2 : index
    %c1_126 = arith.constant 1 : index
    %387 = memref.load %arg9[%c2_125, %c1_126] : memref<3x2xf32, #tpu.memory_space<smem>>
    %cst_127 = arith.constant 0.000000e+00 : f32
    %388 = vector.broadcast %cst_127 : f32 to vector<32x128xf32>
    %389 = arith.cmpf oge, %386, %388 : vector<32x128xf32>
    %390 = vector.broadcast %387 : f32 to vector<32x128xf32>
    %391 = arith.mulf %390, %386 : vector<32x128xf32>
    %392 = arith.select %389, %386, %391 : vector<32x128xi1>, vector<32x128xf32>
    %393 = vector.extract_strided_slice %299 {offsets = [0, 4], sizes = [32, 1], strides = [1, 1]} : vector<32x6xf32> to vector<32x1xf32>
    %394 = vector.extract_strided_slice %299 {offsets = [0, 5], sizes = [32, 1], strides = [1, 1]} : vector<32x6xf32> to vector<32x1xf32>
    %cst_128 = arith.constant dense<0.000000e+00> : vector<128xf32>
    %395 = vector.multi_reduction <add>, %392, %cst_128 [0] : vector<32x128xf32> to vector<128xf32>
    %396 = vector.shape_cast %395 : vector<128xf32> to vector<1x128xf32>
    %397 = arith.mulf %392, %392 : vector<32x128xf32>
    %cst_129 = arith.constant dense<0.000000e+00> : vector<128xf32>
    %398 = vector.multi_reduction <add>, %397, %cst_129 [0] : vector<32x128xf32> to vector<128xf32>
    %399 = vector.shape_cast %398 : vector<128xf32> to vector<1x128xf32>
    %400 = vector.shape_cast %396 : vector<1x128xf32> to vector<1x1x128xf32>
    %cst_130 = arith.constant dense<0.000000e+00> : vector<1xf32>
    %401 = vector.multi_reduction <add>, %400, %cst_130 [1, 2] : vector<1x1x128xf32> to vector<1xf32>
    %402 = vector.shape_cast %401 : vector<1xf32> to vector<1x1x1xf32>
    %403 = vector.extract %402[0, 0, 0] : f32 from vector<1x1x1xf32>
    %404 = vector.broadcast %403 : f32 to vector<1x1xf32>
    %405 = vector.shape_cast %399 : vector<1x128xf32> to vector<1x1x128xf32>
    %cst_131 = arith.constant dense<0.000000e+00> : vector<1xf32>
    %406 = vector.multi_reduction <add>, %405, %cst_131 [1, 2] : vector<1x1x128xf32> to vector<1xf32>
    %407 = vector.shape_cast %406 : vector<1xf32> to vector<1x1x1xf32>
    %408 = vector.extract %407[0, 0, 0] : f32 from vector<1x1x1xf32>
    %409 = vector.broadcast %408 : f32 to vector<1x1xf32>
    %cst_132 = arith.constant 4.096000e+03 : f32
    %410 = vector.broadcast %cst_132 : f32 to vector<1x1xf32>
    %411 = arith.divf %404, %410 : vector<1x1xf32>
    %cst_133 = arith.constant 4.096000e+03 : f32
    %412 = vector.broadcast %cst_133 : f32 to vector<1x1xf32>
    %413 = arith.divf %409, %412 : vector<1x1xf32>
    %414 = arith.mulf %411, %411 : vector<1x1xf32>
    %415 = arith.subf %413, %414 : vector<1x1xf32>
    %cst_134 = arith.constant 0.000000e+00 : f32
    %416 = vector.broadcast %cst_134 : f32 to vector<1x1xf32>
    %417 = arith.maximumf %415, %416 : vector<1x1xf32>
    %cst_135 = arith.constant 9.99999997E-7 : f32
    %418 = vector.broadcast %cst_135 : f32 to vector<1x1xf32>
    %419 = arith.addf %417, %418 : vector<1x1xf32>
    %420 = math.rsqrt %419 : vector<1x1xf32>
    %421 = vector.broadcast %420 : vector<1x1xf32> to vector<32x1xf32>
    %422 = arith.mulf %393, %421 : vector<32x1xf32>
    %423 = vector.broadcast %411 : vector<1x1xf32> to vector<32x1xf32>
    %424 = arith.mulf %422, %423 : vector<32x1xf32>
    %425 = arith.subf %394, %424 : vector<32x1xf32>
    %426 = vector.broadcast %422 : vector<32x1xf32> to vector<32x128xf32>
    %427 = arith.mulf %392, %426 : vector<32x128xf32>
    %428 = vector.broadcast %425 : vector<32x1xf32> to vector<32x128xf32>
    %429 = arith.addf %427, %428 : vector<32x128xf32>
    %c1_136 = arith.constant 1 : index
    %c0_137 = arith.constant 0 : index
    %c0_138 = arith.constant 0 : index
    %430 = vector.load %arg5[%c1_136, %c0_137, %c0_138] : memref<2x16x32xf32, #tpu.memory_space<vmem>>, vector<1x16x32xf32>
    %431 = vector.shape_cast %430 : vector<1x16x32xf32> to vector<16x32xf32>
    %cst_139 = arith.constant dense<0.000000e+00> : vector<16x128xf32>
    %432 = tpu.matmul %431, %429, %cst_139 {dimension_numbers = #tpu.dot_dimension_numbers<[1], [0], [0], [1], [0, 0, 1, 1], [], []>} : vector<16x32xf32>, vector<32x128xf32>, vector<16x128xf32> -> vector<16x128xf32>
    %c1_140 = arith.constant 1 : index
    %c0_141 = arith.constant 0 : index
    %c0_142 = arith.constant 0 : index
    %433 = vector.load %arg6[%c1_140, %c0_141, %c0_142] : memref<2x16x1xf32, #tpu.memory_space<vmem>>, vector<1x16x1xf32>
    %434 = vector.shape_cast %433 : vector<1x16x1xf32> to vector<16x1xf32>
    %435 = vector.broadcast %434 : vector<16x1xf32> to vector<16x128xf32>
    %436 = arith.addf %432, %435 : vector<16x128xf32>
    %c0_143 = arith.constant 0 : index
    %c0_144 = arith.constant 0 : index
    %c0_145 = arith.constant 0 : index
    %437 = vector.load %arg10[%c0_143, %c0_144, %c0_145] : memref<1x16x128xf32, #tpu.memory_space<vmem>>, vector<1x16x128xf32>
    %438 = vector.shape_cast %437 : vector<1x16x128xf32> to vector<16x128xf32>
    %439 = vector.shape_cast %436 : vector<16x128xf32> to vector<1x16x128xf32>
    tpu.vector_store %arg10[%c0_143, %c0_144, %c0_145], %439 {strides = array<i32>} : memref<1x16x128xf32, #tpu.memory_space<vmem>>, vector<1x16x128xf32>,
    return
  }
  func.func @transform_0(%arg0: i32) -> (i32, i32, i32) {
    %c0_i32 = arith.constant 0 : i32
    %c0_i32_0 = arith.constant 0 : i32
    %c0_i32_1 = arith.constant 0 : i32
    return %arg0, %c0_i32, %c0_i32_0 : i32, i32, i32
  }
  func.func @transform_1(%arg0: i32) -> (i32, i32, i32) {
    %c0_i32 = arith.constant 0 : i32
    %c0_i32_0 = arith.constant 0 : i32
    %c0_i32_1 = arith.constant 0 : i32
    return %arg0, %c0_i32, %c0_i32_0 : i32, i32, i32
  }
  func.func @transform_2(%arg0: i32) -> (i32, i32, i32) {
    %c0_i32 = arith.constant 0 : i32
    %c0_i32_0 = arith.constant 0 : i32
    %c0_i32_1 = arith.constant 0 : i32
    %c0_i32_2 = arith.constant 0 : i32
    return %c0_i32, %c0_i32_0, %c0_i32_1 : i32, i32, i32
  }
  func.func @transform_3(%arg0: i32) -> (i32, i32, i32) {
    %c0_i32 = arith.constant 0 : i32
    %c0_i32_0 = arith.constant 0 : i32
    %c0_i32_1 = arith.constant 0 : i32
    %c0_i32_2 = arith.constant 0 : i32
    return %c0_i32, %c0_i32_0, %c0_i32_1 : i32, i32, i32
  }
  func.func @transform_4(%arg0: i32) -> (i32, i32, i32) {
    %c0_i32 = arith.constant 0 : i32
    %c0_i32_0 = arith.constant 0 : i32
    %c0_i32_1 = arith.constant 0 : i32
    %c0_i32_2 = arith.constant 0 : i32
    return %c0_i32, %c0_i32_0, %c0_i32_1 : i32, i32, i32
  }
  func.func @transform_5(%arg0: i32) -> (i32, i32, i32) {
    %c0_i32 = arith.constant 0 : i32
    %c0_i32_0 = arith.constant 0 : i32
    %c0_i32_1 = arith.constant 0 : i32
    %c0_i32_2 = arith.constant 0 : i32
    return %c0_i32, %c0_i32_0, %c0_i32_1 : i32, i32, i32
  }
  func.func @transform_6(%arg0: i32) -> (i32, i32, i32) {
    %c0_i32 = arith.constant 0 : i32
    %c0_i32_0 = arith.constant 0 : i32
    %c0_i32_1 = arith.constant 0 : i32
    %c0_i32_2 = arith.constant 0 : i32
    return %c0_i32, %c0_i32_0, %c0_i32_1 : i32, i32, i32
  }
  func.func @transform_7(%arg0: i32) -> (i32, i32, i32) {
    %c0_i32 = arith.constant 0 : i32
    %c0_i32_0 = arith.constant 0 : i32
    %c0_i32_1 = arith.constant 0 : i32
    %c0_i32_2 = arith.constant 0 : i32
    return %c0_i32, %c0_i32_0, %c0_i32_1 : i32, i32, i32
  }
  func.func @transform_8(%arg0: i32) -> (i32, i32) {
    %c0_i32 = arith.constant 0 : i32
    %c0_i32_0 = arith.constant 0 : i32
    %c0_i32_1 = arith.constant 0 : i32
    return %c0_i32, %c0_i32_0 : i32, i32
  }
  func.func @transform_9(%arg0: i32) -> (i32, i32, i32) {
    %c0_i32 = arith.constant 0 : i32
    %c0_i32_0 = arith.constant 0 : i32
    %c0_i32_1 = arith.constant 0 : i32
    return %arg0, %c0_i32, %c0_i32_0 : i32, i32, i32
  }
}

</mosaic_0001>

<bundles_post_ra>
// kernel: tpu_custom_call.1
= control target key start
LH: loop header
LB: loop body
LE: loop exit
PB: predicated region body
PF: predicated region fallthrough
CT: control target
= control target key end

     0   :  { %14 = vsyncpa [#allocation4], 0  ;;  %s3146_s0 = inlined_call_operand.vmem [shape: f32[2,16,128], index: 0, kind: input, shape index: {}]   ;;  %s3147_s1 = inlined_call_operand.vmem [shape: f32[2,32,1], index: 1, kind: input, shape index: {}]   ;;  %s3148_s2 = inlined_call_operand.vmem [shape: f32[2,32,16], index: 2, kind: input, shape index: {}]   ;;  %s3149_s3 = inlined_call_operand.vmem [shape: f32[3,32,32], index: 3, kind: input, shape index: {}]   ;;  %s3150_s4 = inlined_call_operand.vmem [shape: f32[2,16,32], index: 4, kind: input, shape index: {}]   ;;  %s3151_s5 = inlined_call_operand.vmem [shape: f32[2,16,1], index: 5, kind: input, shape index: {}]   ;;  %s3152_s6 = inlined_call_operand.vmem [shape: f32[3,32,6], index: 6, kind: input, shape index: {}]   ;;  %s3153_s7 = inlined_call_operand.vmem [shape: f32[3,32,3], index: 7, kind: input, shape index: {}]   ;;  %s3154_s8 = inlined_call_operand.vmem [shape: f32[3,2], index: 8, kind: input, shape index: {}]   ;;  %s3155_s9 = inlined_call_operand.hbm [shape: f32[2,16,128], index: 9, kind: output, shape index: {}]  }
   0x1   :  { %15 = vsyncpa [#allocation3], 0 }
   0x2   :  { %17 = vsyncpa [#allocation3 + $0x1], 0  ;;  %s2476_s30 = smov 0   ;;  %s2478_s10 = smov 0  }
   0x3   :  { %s2480_s11 = smov 0   ;;  %s2482_s12 = smov 0  }
   0x4 LB: > { %s2497_s13 = sadd.s32 4294967295, %s2408_s12   ;;  %s2090_s14 = sadd.s32 4294967294, %s2408_s12   ;;  %s2408_s12 = sphi %s2482_s12, %s3161_s12   ;;  %s2404_s11 = sphi %s2480_s11, %s3160_s11   ;;  %s2400_s10 = sphi %s2478_s10, %s3159_s10   ;;  %s2396_s30 = sphi %s2476_s30, %s3158_s30  }
   0x5   : > { %s2501_s15 = sadd.s32 1, %s2408_s12   ;;  %s229_s16 = sadd.s32 1, %s2404_s11 }
   0x6   : > { %s226_s17 = ssub.s32 %s2408_s12, %s2501_s15  ;;  %p239_p0 = scmp.ne.s32.totalorder %s2404_s11, %s2400_s10 }
   0x7   : > { %p227_p1 = scmp.eq.s32.totalorder %s226_s17, 0  ;;  %p240_p2 = scmp.eq.s32.totalorder %s2497_s13, 1 }
   0x8   : > { %p245_p3 = scmp.ne.s32.totalorder %s2400_s10, %s2396_s30  ;;  %p246_p4 = scmp.eq.s32.totalorder %s2090_s14, 1 }
   0x9   : > { %s2512_s18 = scalar_select %p227_p1, %s2404_s11, %s229_s16  }
   0xa   : > { %p2514_p5 = por %p240_p2, %p239_p0  ;;  %p2518_p6 = por %p246_p4, %p245_p3 }
   0xb   : > { %p2091_p7 = scmp.ge.s32.totalorder %s2408_s12, 1  ;;  %p253_p8 = scmp.lt.s32.totalorder %s2408_s12, 3 }
   0xc   : > { %p2196_p9 = scmp.eq.s32.totalorder %s2497_s13, 0  ;;  %s283_s23 = sshll.u32 %s3154_s8, 4  ;;  %s284_s23 = int_to_ptr.vmem [resolvable:$true] %s283_s23 }
   0xd   : > { %p254_p10 = pnand %p2091_p7, %p253_p8  ;;  %s2410_s24 = smov [#allocation2]  }
   0xf   : > { %p2188_p11 = pneg %p254_p10  ;;  %312 = sbr.rel (%p254_p10) target bundleno = 4031 (0xfbf), region = 56 }
  0x11   : > { %p2189_p12 = pnand %p2196_p9, %p2188_p11 }
  0x13   : > { %2191 = dma.vmem_to_smem (!%p2189_p12), %s284_s23, 64, %s2410_s24, [#allocation4]  }
  0x14   : > { %2387 = dma.done.wait (%p2196_p9), [#allocation4], 64  }
  0x15   : > { %2389 = vsyncadd (%p2196_p9), [#allocation4], 4294967232 }
  0x16   : > { %319 = sfence }
  0x17   : > { %p355_p13 = scmp.lt.s32.totalorder %s2497_s13, 1  ;;  %v2411_v0 = vmov 0   ;;  %v369_v4 = vld [vmem:[%s3148_s2] sm:$0xff]  ;;  %vm397_vm0 = vcmask 130048   ;;  %v370_v8 = vld [vmem:[%s3148_s2 + $0x8] sm:$0xff]  ;;  %v371_v9 = vld [vmem:[%s3148_s2 + $0x10] sm:$0xff] }
  0x18   : > { %2247 = vset.pattern.permute.xlu0 %v2411_v0  ;;  %2248 = vset.pattern.permute.xlu1 %v2411_v0  ;;  %v372_v10 = vld [vmem:[%s3148_s2 + $0x18] sm:$0xff]  ;;  %vm479_vm5 = vcmask 1040384   ;;  %s2105_s28 = sld [smem:[#allocation2 + $0x1]] }
  0x19   : > { %s356_s25 = scalar_select %p355_p13, %s2497_s13, 1 }
  0x1b   : > { %s2155_s26 = sshll.u32 %s356_s25, 4  ;;  %s2156_s27 = sshll.u32 %s356_s25, 5 }
  0x1c   : > { %s359_s14 = scalar_lea.vmem %s3146_s0, %s2155_s26  ;;  %s364_s21 = scalar_lea.vmem %s3147_s1, %s2156_s27 }
  0x1d   : > { %v2538_v1 = vld [vmem:[%s359_s14 + $0x8] sm:$0xff]  ;;  %v2540_v2 = vld [vmem:[%s359_s14] sm:$0xff]  ;;  %v375_v5 = vld [vmem:[%s364_s21 + $0x10] sm:$0xff]  ;;  %s443_s14 = sld [smem:[#allocation2]]  ;;  %s2414_s27 = smov 1  }
  0x1e   : > { %v373_v3 = vld [vmem:[%s364_s21] sm:$0xff]  ;;  %424 = vmatpush.msra.mxu0 %v2538_v1  ;;  %389 = vperm.xlu1 %2248, %v375_v5   ;;  %v374_v6 = vld [vmem:[%s364_s21 + $0x8] sm:$0xff]  ;;  %v376_v7 = vld [vmem:[%s364_s21 + $0x18] sm:$0xff]  ;;  %s2417_s26 = smov 127   ;;  %s2120_s21 = sld [smem:[#allocation2 + $0x80]] }
  0x1f   : > { %379 = vperm.xlu0 %2247, %v373_v3  }
  0x20   : > { %425 = vmatpush.msra.mxu0 %v2540_v2 }
  0x21   : > { %2101 = vmatmul.msk.f32.vlgmr.msra.gmra.mxu0 %vm397_vm0, %v369_v4 }
  0x23   : > { %v448_v18 = vstv %s443_s14 }
  0x26   : > { %394 = vperm.xlu1 %2248, %v376_v7  }
  0x27   : > { %384 = vperm.xlu0 %2247, %v374_v6  }
  0x29   : > { %2102 = vmatmul.msk.f32.gmra.mxu0 %vm397_vm0, %v370_v8 }
  0x31   : > { %2103 = vmatmul.msk.f32.gmra.mxu0 %vm397_vm0, %v371_v9  ;;  %v2412_v9 = vmov 4096.0  }
  0x32   : > { %2313 = vrcp.f32 %v2412_v9 }
  0x39   : > { %2104 = vmatmul.msk.f32.gmra.mxu0 %vm397_vm0, %v372_v10  ;;  %v2314_v10 = vpop.eup %2313 }
  0x3a   : > { %vm507_vm6 = vweird.f32 %v2314_v10 }
  0x90   : > { %v390_v16 = vpop.permute.xlu1 %389 }
  0x91   : > { %v380_v11 = vpop.permute.xlu0 %379 }
  0x98   : > { %v395_v28 = vpop.permute.xlu1 %394 }
  0x99   : > { %v385_v14 = vpop.permute.xlu0 %384 }
  0x9e   : > { %v427_v12 = vpop.f32.mrf.mxu0 }
  0x9f   : > { %v428_v17 = vadd.f32 %v427_v12, %v380_v11  ;;  %v503_v11 = vmul.f32 4096.0, %v2314_v10 }
  0xa1   : > { %v449_v22 = vmul.f32 %v448_v18, %v428_v17  ;;  %vm444_vm2 = vcmp.ge.f32.partialorder %v428_v17, 0.0  ;;  %v504_v12 = vsub.f32 1.0, %v503_v11 }
  0xa3   : > { %v2562_v25 = vsel %vm444_vm2, %v428_v17, %v449_v22 }
  0xa4   : > { %v466_v31 = vmul.f32 %v2562_v25, %v2562_v25 }
  0xa6   : > { %v430_v13 = vpop.f32.mrf.mxu0 }
  0xa7   : > { %v431_v15 = vadd.f32 %v430_v13, %v385_v14  ;;  %v505_v13 = vmul.f32 %v2314_v10, %v504_v12 }
  0xa9   : > { %v450_v20 = vmul.f32 %v448_v18, %v431_v15  ;;  %vm445_vm1 = vcmp.ge.f32.partialorder %v431_v15, 0.0  ;;  %v506_v14 = vadd.f32 %v2314_v10, %v505_v13 }
  0xab   : > { %v2560_v24 = vsel %vm445_vm1, %v431_v15, %v450_v20 }
  0xac   : > { %v467_v27 = vmul.f32 %v2560_v24, %v2560_v24  ;;  %v457_v32 = vadd.f32 %v2560_v24, %v2562_v25 }
  0xae   : > { %v433_v19 = vpop.f32.mrf.mxu0  ;;  %v470_v35 = vadd.f32 %v467_v27, %v466_v31 }
  0xaf   : > { %v434_v21 = vadd.f32 %v433_v19, %v390_v16  ;;  %v2582_v16 = vsel %vm507_vm6, %v2314_v10, %v506_v14 }
  0xb1   : > { %v451_v23 = vmul.f32 %v448_v18, %v434_v21  ;;  %vm446_vm3 = vcmp.ge.f32.partialorder %v434_v21, 0.0 }
  0xb3   : > { %v2564_v26 = vsel %vm446_vm3, %v434_v21, %v451_v23  ;;  %v2413_v21 = vmov 1  }
  0xb4   : > { %v468_v33 = vmul.f32 %v2564_v26, %v2564_v26  ;;  %v458_v36 = vadd.f32 %v457_v32, %v2564_v26  ;;  %2249 = vset.pattern.permute.xlu1 %v2413_v21  ;;  %2250 = vset.pattern.permute.xlu0 %v2413_v21 }
  0xb6   : > { %v436_v29 = vpop.f32.mrf.mxu0  ;;  %v471_v38 = vadd.f32 %v470_v35, %v468_v33  ;;  %v2596_v35 = vld [vmem:[%s3152_s6 + $0x8] sm:$0xff] }
  0xb7   : > { %v437_v30 = vadd.f32 %v436_v29, %v395_v28 }
  0xb9   : > { %vm447_vm4 = vcmp.ge.f32.partialorder %v437_v30, 0.0  ;;  %v452_v34 = vmul.f32 %v448_v18, %v437_v30 }
  0xbb   : > { %v2575_v37 = vsel %vm447_vm4, %v437_v30, %v452_v34  ;;  %v2591_v34 = vld [vmem:[%s3152_s6 + $0x10] sm:$0xff]  ;;  %vm901_vm4 = vcmask 261120  }
  0xbc   : > { %v459_v39 = vadd.f32 %v458_v36, %v2575_v37  ;;  %v469_v40 = vmul.f32 %v2575_v37, %v2575_v37  ;;  %v2601_v36 = vld [vmem:[%s3152_s6] sm:$0xff] }
  0xbe   : > { %v460_v41 = vrot.slane %v459_v39, 4  ;;  %v472_v42 = vadd.f32 %v471_v38, %v469_v40 }
  0xc0   : > { %v461_v43 = vadd.f32 %v460_v41, %v459_v39  ;;  %v473_v44 = vrot.slane %v472_v42, 4 }
  0xc2   : > { %v462_v45 = vrot.slane %v461_v43, 2  ;;  %v474_v46 = vadd.f32 %v473_v44, %v472_v42 }
  0xc4   : > { %v463_v47 = vadd.f32 %v462_v45, %v461_v43  ;;  %v475_v48 = vrot.slane %v474_v46, 2  ;;  %v2611_v45 = vld [vmem:[%s3152_s6 + $0x18] sm:$0xff] }
  0xc6   : > { %v464_v49 = vrot.slane %v463_v47, 1  ;;  %v476_v50 = vadd.f32 %v475_v48, %v474_v46  ;;  %v602_v48 = vld [vmem:[%s3153_s7 + $0x8] sm:$0xff] }
  0xc8   : > { %v465_v51 = vadd.f32 %v464_v49, %v463_v47  ;;  %v477_v53 = vrot.slane %v476_v50, 1  ;;  %v2622_v49 = vld [vmem:[%s3153_s7 + $0x10] sm:$0xff] }
  0xca   : > { %v480_v52 = vsel %vm479_vm5, %v465_v51, 0.0  ;;  %v478_v54 = vadd.f32 %v477_v53, %v476_v50  ;;  %v601_v50 = vld [vmem:[%s3153_s7] sm:$0xff]  ;;  %v2415_v51 = vmov 3  }
  0xcb   : > { %481 = vadd.xlane.f32.xlu2 %v480_v52  ;;  %v2416_v52 = vmov 2  }
  0xcc   : > { %v491_v55 = vsel %vm479_vm5, %v478_v54, 0.0  ;;  %2251 = vset.pattern.permute.xlu2 %v2415_v51 }
  0xd3   : > { %492 = vadd.xlane.f32.xlu2 %v491_v55 }
 0x13e   : > { %v482_v56 = vpop.xlane.xlu2 %481 }
 0x13f   : > { %v483_v57 = vrot.slane %v482_v56, 4 }
 0x141   : > { %v484_v58 = vadd.f32 %v483_v57, %v482_v56 }
 0x143   : > { %v485_v59 = vrot.slane %v484_v58, 2 }
 0x145   : > { %v486_v60 = vadd.f32 %v485_v59, %v484_v58 }
 0x146   : > { %v493_v61 = vpop.xlane.xlu2 %492 }
 0x147   : > { %v494_v62 = vrot.slane %v493_v61, 4  ;;  %v487_v63 = vrot.slane %v486_v60, 1 }
 0x149   : > { %v495_v3 = vadd.f32 %v494_v62, %v493_v61  ;;  %v488_v4 = vadd.f32 %v487_v63, %v486_v60  ;;  %v604_v60 = vld [vmem:[%s3153_s7 + $0x18] sm:$0xff] }
 0x14b   : > { %2158 = vpush %v488_v4  ;;  %v496_v5 = vrot.slane %v495_v3, 2 }
 0x14d   : > { %v497_v6 = vadd.f32 %v496_v5, %v495_v3 }
 0x14f   : > { %v498_v7 = vrot.slane %v497_v6, 1 }
 0x151   : > { %v499_v8 = vadd.f32 %v498_v7, %v497_v6 }
 0x153   : > { %2160 = vpush %v499_v8 }
 0x17c   : > { %s2159_s16 = spop %2158 }
 0x17d   : > { %v490_v15 = vstv %s2159_s16 }
 0x17e   : > { %v509_v17 = vmul.f32 %v2582_v16, %v490_v15 }
 0x180   : > { %v511_v20 = vmul.f32 %v509_v17, %v509_v17 }
 0x184   : > { %s2161_s17 = spop %2160 }
 0x185   : > { %v501_v18 = vstv %s2161_s17  ;;  %s2138_s17 = sld [smem:[#allocation2 + $0x100]] }
 0x186   : > { %v510_v19 = vmul.f32 %v2582_v16, %v501_v18 }
 0x188   : > { %v512_v22 = vsub.f32 %v510_v19, %v511_v20 }
 0x18a   : > { %v513_v23 = vmax.f32 %v512_v22, 0.0 }
 0x18c   : > { %v514_v27 = vadd.f32 1e-06, %v513_v23 }
 0x18e   : > { %2315 = vrsqrt.f32 %v514_v27  ;;  %vm521_vm8 = vweird.f32 %v514_v27 }
 0x194   : > { %v2316_v28 = vpop.eup %2315 }
 0x195   : > { %v516_v29 = vmul.f32 %v2316_v28, %v514_v27  ;;  %vm522_vm7 = vweird.f32 %v2316_v28 }
 0x196   : > { %vm523_vm9 = vmor %vm521_vm8, %vm522_vm7 }
 0x197   : > { %v517_v30 = vmul.f32 %v2316_v28, %v516_v29 }
 0x199   : > { %v518_v31 = vmul.f32 0.5, %v517_v30 }
 0x19b   : > { %v519_v32 = vsub.f32 1.5, %v518_v31 }
 0x19d   : > { %v520_v33 = vmul.f32 %v2316_v28, %v519_v32 }
 0x19f   : > { %v524_v38 = vsel %vm523_vm9, %v2316_v28, %v520_v33  ;;  %v365_v33 = vlaneseq }
 0x1a0   : > { %v527_v39 = vmul.f32 %v524_v38, %v2591_v34  ;;  %v526_v40 = vmul.f32 %v524_v38, %v2596_v35  ;;  %v525_v41 = vmul.f32 %v524_v38, %v2601_v36  ;;  %v528_v46 = vmul.f32 %v524_v38, %v2611_v45 }
 0x1a2   : > { %v531_v42 = vmul.f32 %v527_v39, %v509_v17  ;;  %v530_v43 = vmul.f32 %v526_v40, %v509_v17  ;;  %v529_v44 = vmul.f32 %v525_v41, %v509_v17  ;;  %v532_v47 = vmul.f32 %v528_v46, %v509_v17 }
 0x1a4   : > { %541 = vrot.lane.b32.xlu2 %v531_v42, %s2414_s27  ;;  %539 = vrot.lane.b32.xlu1 %v530_v43, %s2414_s27 }
 0x1a5   : > { %537 = vrot.lane.b32.xlu0 %v529_v44, %s2414_s27 }
 0x1ac   : > { %555 = vperm.xlu1 %2249, %v525_v41   ;;  %631 = vperm.xlu2 %2251, %v2601_v36  }
 0x1ad   : > { %543 = vrot.lane.b32.xlu0 %v532_v47, %s2414_s27 }
 0x1b4   : > { %565 = vperm.xlu1 %2249, %v527_v39   ;;  %2253 = vset.pattern.permute.xlu2 %v2411_v0  ;;  %v2663_v39 = vand.u32 127, %v365_v33 }
 0x1b5   : > { %560 = vperm.xlu0 %2250, %v526_v40   ;;  %676 = vperm.xlu2 %2253, %v602_v48  }
 0x1b6   : > { %v703_v43 = vadd.s32 1, %v2663_v39 }
 0x1b8   : > { %vm705_vm11 = vcmp.lt.s32.totalorder %v703_v43, 128 }
 0x1bc   : > { %612 = vperm.xlu1 %2249, %v602_v48  }
 0x1bd   : > { %570 = vperm.xlu0 %2250, %v528_v46   ;;  %2255 = vset.pattern.permute.xlu2 %v2416_v52 }
 0x1c4   : > { %617 = vperm.xlu1 %2249, %v2622_v49  }
 0x1c5   : > { %607 = vperm.xlu0 %2250, %v601_v50  }
 0x1cc   : > { %2252 = vset.pattern.permute.xlu1 %v2411_v0 }
 0x1cd   : > { %2258 = vset.pattern.permute.xlu0 %v2411_v0  ;;  %672 = vperm.xlu1 %2252, %v601_v50  }
 0x1ce   : > { %680 = vperm.xlu0 %2258, %v2622_v49  }
 0x1d5   : > { %2254 = vset.pattern.permute.xlu1 %v2416_v52 }
 0x1d6   : > { %2259 = vset.pattern.permute.xlu0 %v2415_v51 }
 0x1d7   : > { %636 = vperm.xlu0 %2259, %v2596_v35  }
 0x1fe   : > { %v542_v57 = vpop.permute.xlu2 %541 }
 0x1ff   : > { %v551_v58 = vsub.f32 %v2591_v34, %v542_v57 }
 0x206   : > { %v2651_v63 = vpop.permute.xlu2 %631 }
 0x20f   : > { %v677_v4 = vpop.permute.xlu2 %676 }
 0x216   : > { %v540_v53 = vpop.permute.xlu1 %539 }
 0x217   : > { %v550_v54 = vsub.f32 %v2596_v35, %v540_v53  ;;  %v538_v55 = vpop.permute.xlu0 %537 }
 0x218   : > { %v549_v56 = vsub.f32 %v2601_v36, %v538_v55 }
 0x219   : > { %584 = vperm.xlu2 %2255, %v550_v54  }
 0x21a   : > { %579 = vperm.xlu1 %2254, %v549_v56  }
 0x21e   : > { %v556_v62 = vpop.permute.xlu1 %555 }
 0x21f   : > { %v544_v59 = vpop.permute.xlu0 %543  ;;  %v573_v12 = vmul.f32 %v556_v62, %v2562_v25 }
 0x220   : > { %v552_v61 = vsub.f32 %v2611_v45, %v544_v59 }
 0x221   : > { %2257 = vset.pattern.permute.xlu2 %v2415_v51 }
 0x222   : > { %589 = vperm.xlu1 %2254, %v551_v58   ;;  %641 = vperm.xlu2 %2257, %v2591_v34  }
 0x226   : > { %v566_v3 = vpop.permute.xlu1 %565 }
 0x227   : > { %v561_v5 = vpop.permute.xlu0 %560  ;;  %v575_v15 = vmul.f32 %v566_v3, %v2564_v26 }
 0x228   : > { %v574_v7 = vmul.f32 %v561_v5, %v2560_v24 }
 0x22a   : > { %2256 = vset.pattern.permute.xlu1 %v2413_v21  ;;  %2261 = vset.pattern.permute.xlu2 %v2416_v52 }
 0x22b   : > { %622 = vperm.xlu1 %2256, %v604_v60   ;;  %594 = vperm.xlu2 %2261, %v552_v61  }
 0x22e   : > { %v613_v6 = vpop.permute.xlu1 %612 }
 0x22f   : > { %v571_v20 = vpop.permute.xlu0 %570 }
 0x230   : > { %v576_v25 = vmul.f32 %v571_v20, %v2575_v37  ;;  %v661_v37 = vadd.s32 4294967295, %v2663_v39 }
 0x232   : > { %vm662_vm10 = vcmp.ge.s32.totalorder %v661_v37, 0 }
 0x233   : > { %718 = vperm.xlu2 %2261, %v602_v48   ;;  %2260 = vset.pattern.permute.xlu1 %v2416_v52 }
 0x234   : > { %714 = vperm.xlu1 %2260, %v601_v50  }
 0x236   : > { %v618_v10 = vpop.permute.xlu1 %617 }
 0x237   : > { %v608_v26 = vpop.permute.xlu0 %607 }
 0x23c   : > { %2262 = vset.pattern.permute.xlu1 %v2411_v0 }
 0x23f   : > { %v673_v11 = vpop.permute.xlu1 %672 }
 0x240   : > { %v681_v28 = vpop.permute.xlu0 %680 }
 0x249   : > { %v637_v31 = vpop.permute.xlu0 %636 }
 0x273   : > { %v585_v8 = vpop.permute.xlu2 %584 }
 0x274   : > { %v598_v9 = vadd.f32 %v585_v8, %v574_v7 }
 0x276   : > { %655 = vrot.lane.b32.xlu0 %v598_v9, %s2414_s27  ;;  %v626_v46 = vmul.f32 %v613_v6, %v598_v9 }
 0x27c   : > { %v642_v19 = vpop.permute.xlu2 %641 }
 0x27e   : > { %697 = vrot.lane.b32.xlu0 %v598_v9, %s2417_s26 }
 0x285   : > { %v595_v22 = vpop.permute.xlu2 %594 }
 0x286   : > { %646 = vperm.xlu0 %2259, %v2611_v45   ;;  %v600_v23 = vadd.f32 %v595_v22, %v576_v25 }
 0x28c   : > { %v580_v13 = vpop.permute.xlu1 %579 }
 0x28d   : > { %v597_v14 = vadd.f32 %v580_v13, %v573_v12  ;;  %v719_v27 = vpop.permute.xlu2 %718 }
 0x28f   : > { %653 = vrot.lane.b32.xlu2 %v597_v14, %s2414_s27  ;;  %v625_v50 = vmul.f32 %v608_v26, %v597_v14 }
 0x291   : > { %v649_v62 = vadd.f32 %v2651_v63, %v625_v50 }
 0x294   : > { %v590_v17 = vpop.permute.xlu1 %589 }
 0x295   : > { %v599_v24 = vadd.f32 %v590_v17, %v575_v15  ;;  %v742_v15 = vstv %s2105_s28 }
 0x297   : > { %v627_v18 = vmul.f32 %v618_v10, %v599_v24  ;;  %657 = vrot.lane.b32.xlu1 %v599_v24, %s2414_s27  ;;  %695 = vrot.lane.b32.xlu2 %v597_v14, %s2417_s26 }
 0x299   : > { %v651_v5 = vadd.f32 %v642_v19, %v627_v18 }
 0x29d   : > { %v623_v30 = vpop.permute.xlu1 %622 }
 0x29e   : > { %v628_v20 = vmul.f32 %v623_v30, %v600_v23 }
 0x29f   : > { %684 = vperm.xlu1 %2262, %v604_v60   ;;  %722 = vperm.xlu2 %2261, %v2622_v49  }
 0x2a6   : > { %v715_v38 = vpop.permute.xlu1 %714 }
 0x2a7   : > { %699 = vrot.lane.b32.xlu2 %v599_v24, %s2417_s26  ;;  %659 = vrot.lane.b32.xlu1 %v600_v23, %s2414_s27 }
 0x2af   : > { %726 = vperm.xlu2 %2261, %v604_v60   ;;  %701 = vrot.lane.b32.xlu1 %v600_v23, %s2417_s26  ;;  %v650_v60 = vadd.f32 %v637_v31, %v626_v46 }
 0x2e8   : > { %v656_v40 = vpop.permute.xlu0 %655 }
 0x2e9   : > { %v654_v29 = vpop.permute.xlu2 %653  ;;  %v668_v48 = vsel %vm662_vm10, %v656_v40, 0.0 }
 0x2ea   : > { %v667_v47 = vsel %vm662_vm10, %v654_v29, 0.0  ;;  %v688_v57 = vmul.f32 %v677_v4, %v668_v48 }
 0x2eb   : > { %v687_v56 = vmul.f32 %v673_v11, %v667_v47 }
 0x2ec   : > { %v692_v7 = vadd.f32 %v688_v57, %v650_v60 }
 0x2ed   : > { %v691_v8 = vadd.f32 %v687_v56, %v649_v62 }
 0x2f0   : > { %v698_v44 = vpop.permute.xlu0 %697 }
 0x2f1   : > { %v696_v32 = vpop.permute.xlu2 %695  ;;  %v710_v54 = vsel %vm705_vm11, %v698_v44, 0.0 }
 0x2f2   : > { %v709_v55 = vsel %vm705_vm11, %v696_v32, 0.0  ;;  %v730_v61 = vmul.f32 %v719_v27, %v710_v54 }
 0x2f3   : > { %v729_v3 = vmul.f32 %v715_v38, %v709_v55 }
 0x2f4   : > { %v734_v10 = vadd.f32 %v730_v61, %v692_v7 }
 0x2f5   : > { %v733_v12 = vadd.f32 %v729_v3, %v691_v8 }
 0x2f6   : > { %v744_v17 = vmul.f32 %v742_v15, %v734_v10  ;;  %vm739_vm12 = vcmp.ge.f32.partialorder %v734_v10, 0.0 }
 0x2f7   : > { %v743_v24 = vmul.f32 %v742_v15, %v733_v12  ;;  %vm738_vm13 = vcmp.ge.f32.partialorder %v733_v12, 0.0 }
 0x2f8   : > { %v647_v63 = vpop.permute.xlu0 %646  ;;  %v2675_v22 = vsel %vm739_vm12, %v734_v10, %v744_v17 }
 0x2f9   : > { %v723_v41 = vpop.permute.xlu2 %722  ;;  %v2677_v25 = vsel %vm738_vm13, %v733_v12, %v743_v24  ;;  %v652_v26 = vadd.f32 %v647_v63, %v628_v20  ;;  %v761_v38 = vmul.f32 %v2675_v22, %v2675_v22 }
 0x2fa   : > { %v760_v23 = vmul.f32 %v2677_v25, %v2677_v25  ;;  %v751_v40 = vadd.f32 %v2675_v22, %v2677_v25 }
 0x301   : > { %v700_v58 = vpop.permute.xlu2 %699 }
 0x302   : > { %v711_v6 = vsel %vm705_vm11, %v700_v58, 0.0 }
 0x303   : > { %v731_v13 = vmul.f32 %v723_v41, %v711_v6 }
 0x309   : > { %v658_v42 = vpop.permute.xlu1 %657 }
 0x30a   : > { %v669_v49 = vsel %vm662_vm10, %v658_v42, 0.0  ;;  %v764_v42 = vadd.f32 %v761_v38, %v760_v23 }
 0x30b   : > { %v689_v59 = vmul.f32 %v681_v28, %v669_v49  ;;  %v727_v28 = vpop.permute.xlu2 %726 }
 0x30d   : > { %v693_v9 = vadd.f32 %v689_v59, %v651_v5 }
 0x30f   : > { %v735_v11 = vadd.f32 %v731_v13, %v693_v9 }
 0x311   : > { %v685_v53 = vpop.permute.xlu1 %684  ;;  %v745_v18 = vmul.f32 %v742_v15, %v735_v11  ;;  %vm740_vm14 = vcmp.ge.f32.partialorder %v735_v11, 0.0 }
 0x313   : > { %v2680_v31 = vsel %vm740_vm14, %v735_v11, %v745_v18  ;;  %v2418_v18 = vmov 4  }
 0x314   : > { %v762_v37 = vmul.f32 %v2680_v31, %v2680_v31  ;;  %v752_v43 = vadd.f32 %v751_v40, %v2680_v31  ;;  %2265 = vset.pattern.permute.xlu1 %v2418_v18  ;;  %2263 = vset.pattern.permute.xlu2 %v2418_v18 }
 0x316   : > { %v765_v48 = vadd.f32 %v764_v42, %v762_v37 }
 0x319   : > { %v660_v14 = vpop.permute.xlu1 %659 }
 0x31a   : > { %v670_v4 = vsel %vm662_vm10, %v660_v14, 0.0 }
 0x31b   : > { %v690_v19 = vmul.f32 %v685_v53, %v670_v4 }
 0x31d   : > { %v694_v32 = vadd.f32 %v690_v19, %v652_v26 }
 0x321   : > { %v702_v27 = vpop.permute.xlu1 %701 }
 0x322   : > { %v712_v29 = vsel %vm705_vm11, %v702_v27, 0.0 }
 0x323   : > { %v732_v33 = vmul.f32 %v727_v28, %v712_v29 }
 0x325   : > { %v736_v30 = vadd.f32 %v732_v33, %v694_v32 }
 0x327   : > { %vm741_vm15 = vcmp.ge.f32.partialorder %v736_v30, 0.0  ;;  %v746_v41 = vmul.f32 %v742_v15, %v736_v30 }
 0x329   : > { %v2691_v44 = vsel %vm741_vm15, %v736_v30, %v746_v41 }
 0x32a   : > { %v763_v46 = vmul.f32 %v2691_v44, %v2691_v44  ;;  %v753_v47 = vadd.f32 %v752_v43, %v2691_v44 }
 0x32c   : > { %v754_v49 = vrot.slane %v753_v47, 4  ;;  %v766_v50 = vadd.f32 %v765_v48, %v763_v46 }
 0x32e   : > { %v755_v53 = vadd.f32 %v754_v49, %v753_v47  ;;  %v767_v54 = vrot.slane %v766_v50, 4 }
 0x330   : > { %v756_v55 = vrot.slane %v755_v53, 2  ;;  %v768_v56 = vadd.f32 %v767_v54, %v766_v50 }
 0x332   : > { %v757_v57 = vadd.f32 %v756_v55, %v755_v53  ;;  %v769_v58 = vrot.slane %v768_v56, 2 }
 0x334   : > { %v758_v59 = vrot.slane %v757_v57, 1  ;;  %v770_v60 = vadd.f32 %v769_v58, %v768_v56  ;;  %v2419_v56 = vmov 5  }
 0x335   : > { %2264 = vset.pattern.permute.xlu0 %v2419_v56 }
 0x336   : > { %v759_v61 = vadd.f32 %v758_v59, %v757_v57  ;;  %v771_v62 = vrot.slane %v770_v60, 1 }
 0x338   : > { %v773_v3 = vsel %vm479_vm5, %v759_v61, 0.0  ;;  %v772_v5 = vadd.f32 %v771_v62, %v770_v60 }
 0x339   : > { %774 = vadd.xlane.f32.xlu0 %v773_v3 }
 0x33a   : > { %v784_v6 = vsel %vm479_vm5, %v772_v5, 0.0 }
 0x33b   : > { %785 = vadd.xlane.f32.xlu1 %v784_v6 }
 0x3ac   : > { %v775_v7 = vpop.xlane.xlu0 %774 }
 0x3ad   : > { %v776_v8 = vrot.slane %v775_v7, 4 }
 0x3ae   : > { %v786_v9 = vpop.xlane.xlu1 %785 }
 0x3af   : > { %v777_v10 = vadd.f32 %v776_v8, %v775_v7  ;;  %v787_v12 = vrot.slane %v786_v9, 4 }
 0x3b1   : > { %v778_v13 = vrot.slane %v777_v10, 2  ;;  %v788_v14 = vadd.f32 %v787_v12, %v786_v9 }
 0x3b3   : > { %v789_v15 = vrot.slane %v788_v14, 2  ;;  %v779_v11 = vadd.f32 %v778_v13, %v777_v10 }
 0x3b5   : > { %v780_v4 = vrot.slane %v779_v11, 1  ;;  %v790_v17 = vadd.f32 %v789_v15, %v788_v14  ;;  %v889_v15 = vld [vmem:[%s3151_s5] sm:$0xff] }
 0x3b7   : > { %v781_v24 = vadd.f32 %v780_v4, %v779_v11  ;;  %v791_v63 = vrot.slane %v790_v17, 1  ;;  %v890_v11 = vld [vmem:[%s3151_s5 + $0x8] sm:$0xff]  ;;  %v2744_v4 = vld [vmem:[%s3152_s6 + $0x38] sm:$0xff] }
 0x3b9   : > { %2162 = vpush %v781_v24  ;;  %v792_v20 = vadd.f32 %v791_v63, %v790_v17 }
 0x3bb   : > { %2164 = vpush %v792_v20  ;;  %v887_v20 = vld [vmem:[%s3150_s4] sm:$0xff] }
 0x3ea   : > { %s2163_s29 = spop %2162 }
 0x3eb   : > { %v783_v19 = vstv %s2163_s29 }
 0x3ec   : > { %v795_v26 = vmul.f32 %v783_v19, %v2582_v16  ;;  %s2165_s14 = spop %2164  ;;  %v888_v19 = vld [vmem:[%s3150_s4 + $0x8] sm:$0xff] }
 0x3ed   : > { %v794_v27 = vstv %s2165_s14 }
 0x3ee   : > { %v796_v28 = vmul.f32 %v794_v27, %v2582_v16  ;;  %v797_v29 = vmul.f32 %v795_v26, %v795_v26 }
 0x3f0   : > { %v798_v32 = vsub.f32 %v796_v28, %v797_v29  ;;  %v2761_v29 = vld [vmem:[%s3152_s6 + $0x28] sm:$0xff] }
 0x3f2   : > { %v799_v33 = vmax.f32 %v798_v32, 0.0 }
 0x3f4   : > { %v800_v38 = vadd.f32 1e-06, %v799_v33 }
 0x3f6   : > { %2317 = vrsqrt.f32 %v800_v38  ;;  %vm807_vm2 = vweird.f32 %v800_v38 }
 0x3fc   : > { %v2318_v23 = vpop.eup %2317 }
 0x3fd   : > { %v802_v30 = vmul.f32 %v2318_v23, %v800_v38  ;;  %vm808_vm1 = vweird.f32 %v2318_v23 }
 0x3fe   : > { %vm809_vm3 = vmor %vm807_vm2, %vm808_vm1 }
 0x3ff   : > { %v803_v40 = vmul.f32 %v2318_v23, %v802_v30  ;;  %v2108_v30 = vld [vmem:[%s3148_s2 + $0x20] sm:$0xff] }
 0x401   : > { %v804_v37 = vmul.f32 0.5, %v803_v40  ;;  %v2109_v40 = vld [vmem:[%s3148_s2 + $0x28] sm:$0xff] }
 0x403   : > { %v805_v41 = vsub.f32 1.5, %v804_v37 }
 0x405   : > { %v806_v42 = vmul.f32 %v2318_v23, %v805_v41 }
 0x407   : > { %v810_v43 = vsel %vm809_vm3, %v2318_v23, %v806_v42 }
 0x408   : > { %v812_v46 = vmul.f32 %v810_v43, %v2596_v35  ;;  %v814_v47 = vmul.f32 %v810_v43, %v2611_v45  ;;  %v813_v49 = vmul.f32 %v810_v43, %v2591_v34  ;;  %v811_v54 = vmul.f32 %v810_v43, %v2601_v36 }
 0x40a   : > { %846 = vperm.xlu1 %2265, %v812_v46   ;;  %v818_v48 = vmul.f32 %v814_v47, %v795_v26  ;;  %v817_v50 = vmul.f32 %v813_v49, %v795_v26  ;;  %v816_v53 = vmul.f32 %v812_v46, %v795_v26  ;;  %v815_v55 = vmul.f32 %v811_v54, %v795_v26 }
 0x40c   : > { %829 = vrot.lane.b32.xlu2 %v818_v48, %s2414_s27 }
 0x412   : > { %2267 = vset.pattern.permute.xlu1 %v2419_v56 }
 0x414   : > { %827 = vrot.lane.b32.xlu2 %v817_v50, %s2414_s27 }
 0x41c   : > { %825 = vrot.lane.b32.xlu2 %v816_v53, %s2414_s27 }
 0x424   : > { %823 = vrot.lane.b32.xlu2 %v815_v55, %s2414_s27 }
 0x42c   : > { %856 = vperm.xlu2 %2263, %v814_v47  }
 0x434   : > { %851 = vperm.xlu2 %2263, %v813_v49   ;;  %v1009_v49 = vstv %s2120_s21  ;;  %s2420_s21 = smov 2  }
 0x43c   : > { %841 = vperm.xlu2 %2263, %v811_v54  }
 0x444   : > { %2266 = vset.pattern.permute.xlu2 %v2419_v56 }
 0x466   : > { %v830_v57 = vpop.permute.xlu2 %829 }
 0x467   : > { %v838_v58 = vsub.f32 %v2611_v45, %v830_v57 }
 0x469   : > { %880 = vperm.xlu0 %2264, %v838_v58  }
 0x46e   : > { %v828_v59 = vpop.permute.xlu2 %827 }
 0x46f   : > { %v837_v60 = vsub.f32 %v2591_v34, %v828_v59 }
 0x471   : > { %875 = vperm.xlu2 %2266, %v837_v60   ;;  %2270 = vset.pattern.permute.xlu0 %v2411_v0 }
 0x472   : > { %950 = vperm.xlu0 %2270, %v2761_v29  }
 0x476   : > { %v826_v61 = vpop.permute.xlu2 %825 }
 0x477   : > { %v836_v62 = vsub.f32 %v2596_v35, %v826_v61 }
 0x479   : > { %870 = vperm.xlu2 %2266, %v836_v62  }
 0x47a   : > { %2271 = vset.pattern.permute.xlu0 %v2413_v21 }
 0x47c   : > { %v847_v9 = vpop.permute.xlu1 %846 }
 0x47d   : > { %v860_v14 = vmul.f32 %v847_v9, %v2675_v22  ;;  %v2737_v22 = vld [vmem:[%s3152_s6 + $0x20] sm:$0xff] }
 0x47e   : > { %v824_v3 = vpop.permute.xlu2 %823 }
 0x47f   : > { %v835_v5 = vsub.f32 %v2601_v36, %v824_v3 }
 0x481   : > { %865 = vperm.xlu1 %2267, %v835_v5   ;;  %2268 = vset.pattern.permute.xlu2 %v2411_v0 }
 0x482   : > { %898 = vperm.xlu2 %2268, %v890_v11  }
 0x486   : > { %v857_v45 = vpop.permute.xlu2 %856 }
 0x487   : > { %v862_v34 = vmul.f32 %v857_v45, %v2691_v44 }
 0x489   : > { %2269 = vset.pattern.permute.xlu1 %v2411_v0 }
 0x48a   : > { %893 = vperm.xlu1 %2269, %v889_v15   ;;  %945 = vperm.xlu2 %2268, %v2737_v22  }
 0x48e   : > { %v852_v6 = vpop.permute.xlu2 %851 }
 0x48f   : > { %v861_v12 = vmul.f32 %v852_v6, %v2680_v31  ;;  %v2732_v31 = vld [vmem:[%s3152_s6 + $0x30] sm:$0xff] }
 0x492   : > { %955 = vperm.xlu1 %2269, %v2732_v31   ;;  %960 = vperm.xlu2 %2268, %v2744_v4  }
 0x496   : > { %v842_v7 = vpop.permute.xlu2 %841 }
 0x497   : > { %v859_v17 = vmul.f32 %v842_v7, %v2677_v25 }
 0x49a   : > { %2272 = vset.pattern.permute.xlu1 %v2413_v21  ;;  %2273 = vset.pattern.permute.xlu2 %v2413_v21 }
 0x4cb   : > { %v876_v8 = vpop.permute.xlu2 %875 }
 0x4cc   : > { %v885_v36 = vadd.f32 %v876_v8, %v861_v12 }
 0x4d3   : > { %v871_v13 = vpop.permute.xlu2 %870 }
 0x4d4   : > { %v884_v44 = vadd.f32 %v871_v13, %v860_v14 }
 0x4db   : > { %v881_v10 = vpop.permute.xlu0 %880 }
 0x4dc   : > { %v886_v35 = vadd.f32 %v881_v10, %v862_v34  ;;  %v899_v27 = vpop.permute.xlu2 %898 }
 0x4de   : > { %920 = vmatpush.msra.mxu1 %v886_v35 }
 0x4e0   : > { %921 = vmatpush.msra.mxu1 %v885_v36 }
 0x4e2   : > { %922 = vmatpush.msra.mxu1 %v884_v44 }
 0x4e4   : > { %v951_v42 = vpop.permute.xlu0 %950  ;;  %v946_v46 = vpop.permute.xlu2 %945 }
 0x4ec   : > { %v961_v61 = vpop.permute.xlu2 %960 }
 0x4f3   : > { %v866_v24 = vpop.permute.xlu1 %865 }
 0x4f4   : > { %v883_v63 = vadd.f32 %v866_v24, %v859_v17 }
 0x4f6   : > { %923 = vmatpush.msra.mxu1 %v883_v63 }
 0x4f7   : > { %2106 = vmatmul.msk.f32.vlgmr.msra.gmra.mxu1 %vm901_vm4, %v887_v20 }
 0x4fc   : > { %v894_v25 = vpop.permute.xlu1 %893 }
 0x4ff   : > { %2107 = vmatmul.msk.f32.gmra.mxu1 %vm901_vm4, %v888_v19 }
 0x504   : > { %v956_v48 = vpop.permute.xlu1 %955 }
 0x574   : > { %v925_v26 = vpop.f32.mrf.mxu1 }
 0x575   : > { %v926_v32 = vadd.f32 %v925_v26, %v894_v25 }
 0x577   : > { %v931_v23 = vadd.f32 %v926_v32, %v2540_v2  ;;  %v2111_v2 = vld [vmem:[%s3148_s2 + $0x38] sm:$0xff] }
 0x57c   : > { %v928_v28 = vpop.f32.mrf.mxu1 }
 0x57d   : > { %v929_v33 = vadd.f32 %v928_v28, %v899_v27 }
 0x57f   : > { %v932_v38 = vadd.f32 %v929_v33, %v2538_v1  ;;  %v2110_v1 = vld [vmem:[%s3148_s2 + $0x30] sm:$0xff] }
 0x581   : > { %989 = vmatpush.msra.mxu2 %v932_v38 }
 0x583   : > { %990 = vmatpush.msra.mxu2 %v931_v23 }
 0x584   : > { %2116 = vmatmul.msk.f32.vlgmr.msra.gmra.mxu2 %vm397_vm0, %v2108_v30 }
 0x58c   : > { %2117 = vmatmul.msk.f32.gmra.mxu2 %vm397_vm0, %v2109_v40 }
 0x594   : > { %2118 = vmatmul.msk.f32.gmra.mxu2 %vm397_vm0, %v2110_v1 }
 0x59c   : > { %2119 = vmatmul.msk.f32.gmra.mxu2 %vm397_vm0, %v2111_v2 }
 0x607   : > { %v992_v37 = vpop.f32.mrf.mxu2 }
 0x608   : > { %v993_v47 = vadd.f32 %v992_v37, %v946_v46 }
 0x60a   : > { %v1010_v55 = vmul.f32 %v1009_v49, %v993_v47  ;;  %vm1005_vm7 = vcmp.ge.f32.partialorder %v993_v47, 0.0 }
 0x60c   : > { %v2785_v59 = vsel %vm1005_vm7, %v993_v47, %v1010_v55 }
 0x60d   : > { %v1027_v45 = vmul.f32 %v2785_v59, %v2785_v59 }
 0x60f   : > { %v995_v41 = vpop.f32.mrf.mxu2 }
 0x610   : > { %v996_v43 = vadd.f32 %v995_v41, %v951_v42 }
 0x612   : > { %v1011_v53 = vmul.f32 %v1009_v49, %v996_v43  ;;  %vm1006_vm6 = vcmp.ge.f32.partialorder %v996_v43, 0.0 }
 0x614   : > { %v2783_v58 = vsel %vm1006_vm6, %v996_v43, %v1011_v53 }
 0x615   : > { %v1028_v62 = vmul.f32 %v2783_v58, %v2783_v58  ;;  %v1018_v6 = vadd.f32 %v2783_v58, %v2785_v59 }
 0x617   : > { %v998_v50 = vpop.f32.mrf.mxu2  ;;  %v1031_v34 = vadd.f32 %v1028_v62, %v1027_v45 }
 0x618   : > { %v999_v54 = vadd.f32 %v998_v50, %v956_v48 }
 0x61a   : > { %v1012_v57 = vmul.f32 %v1009_v49, %v999_v54  ;;  %vm1007_vm8 = vcmp.ge.f32.partialorder %v999_v54, 0.0 }
 0x61c   : > { %v2787_v60 = vsel %vm1007_vm8, %v999_v54, %v1012_v57 }
 0x61d   : > { %v1029_v7 = vmul.f32 %v2787_v60, %v2787_v60  ;;  %v1019_v9 = vadd.f32 %v1018_v6, %v2787_v60 }
 0x61f   : > { %v1001_v3 = vpop.f32.mrf.mxu2  ;;  %v1032_v12 = vadd.f32 %v1031_v34, %v1029_v7 }
 0x620   : > { %v1002_v5 = vadd.f32 %v1001_v3, %v961_v61 }
 0x622   : > { %vm1008_vm0 = vcmp.ge.f32.partialorder %v1002_v5, 0.0  ;;  %v1013_v8 = vmul.f32 %v1009_v49, %v1002_v5 }
 0x624   : > { %v2798_v10 = vsel %vm1008_vm0, %v1002_v5, %v1013_v8 }
 0x625   : > { %v1020_v35 = vadd.f32 %v1019_v9, %v2798_v10  ;;  %v1030_v13 = vmul.f32 %v2798_v10, %v2798_v10 }
 0x627   : > { %v1021_v14 = vrot.slane %v1020_v35, 4  ;;  %v1033_v36 = vadd.f32 %v1032_v12, %v1030_v13 }
 0x629   : > { %v1022_v15 = vadd.f32 %v1021_v14, %v1020_v35  ;;  %v1034_v11 = vrot.slane %v1033_v36, 4 }
 0x62b   : > { %v1023_v44 = vrot.slane %v1022_v15, 2  ;;  %v1035_v17 = vadd.f32 %v1034_v11, %v1033_v36 }
 0x62d   : > { %v1024_v24 = vadd.f32 %v1023_v44, %v1022_v15  ;;  %v1036_v63 = vrot.slane %v1035_v17, 2  ;;  %v2818_v44 = vld [vmem:[%s3153_s7 + $0x30] sm:$0xff] }
 0x62f   : > { %v1025_v20 = vrot.slane %v1024_v24, 1  ;;  %v1037_v19 = vadd.f32 %v1036_v63, %v1035_v17  ;;  %v2122_v17 = vld [vmem:[%s3153_s7 + $0x28] sm:$0xff]  ;;  %v2835_v63 = vld [vmem:[%s3153_s7 + $0x38] sm:$0xff] }
 0x631   : > { %v1026_v26 = vadd.f32 %v1025_v20, %v1024_v24  ;;  %v1038_v25 = vrot.slane %v1037_v19, 1  ;;  %v2121_v24 = vld [vmem:[%s3153_s7 + $0x20] sm:$0xff] }
 0x633   : > { %v1040_v27 = vsel %vm479_vm5, %v1026_v26, 0.0  ;;  %v1039_v28 = vadd.f32 %v1038_v25, %v1037_v19 }
 0x634   : > { %1041 = vadd.xlane.f32.xlu1 %v1040_v27 }
 0x635   : > { %v1051_v32 = vsel %vm479_vm5, %v1039_v28, 0.0 }
 0x636   : > { %1052 = vadd.xlane.f32.xlu2 %v1051_v32 }
 0x6a7   : > { %v1042_v33 = vpop.xlane.xlu1 %1041 }
 0x6a8   : > { %v1043_v38 = vrot.slane %v1042_v33, 4 }
 0x6a9   : > { %v1053_v23 = vpop.xlane.xlu2 %1052 }
 0x6aa   : > { %v1044_v30 = vadd.f32 %v1043_v38, %v1042_v33  ;;  %v1054_v40 = vrot.slane %v1053_v23, 4 }
 0x6ac   : > { %v1045_v1 = vrot.slane %v1044_v30, 2  ;;  %v1055_v2 = vadd.f32 %v1054_v40, %v1053_v23 }
 0x6ae   : > { %v1056_v37 = vrot.slane %v1055_v2, 2  ;;  %v1046_v41 = vadd.f32 %v1045_v1, %v1044_v30 }
 0x6b0   : > { %v1047_v42 = vrot.slane %v1046_v41, 1  ;;  %v1057_v43 = vadd.f32 %v1056_v37, %v1055_v2 }
 0x6b2   : > { %v1048_v46 = vadd.f32 %v1047_v42, %v1046_v41  ;;  %v1058_v47 = vrot.slane %v1057_v43, 1 }
 0x6b4   : > { %2166 = vpush %v1048_v46  ;;  %v1059_v48 = vadd.f32 %v1058_v47, %v1057_v43 }
 0x6b6   : > { %2168 = vpush %v1059_v48 }
 0x6e5   : > { %s2167_s22 = spop %2166 }
 0x6e6   : > { %v1050_v49 = vstv %s2167_s22  ;;  %s2421_s22 = smov 126  }
 0x6e7   : > { %v1062_v50 = vmul.f32 %v1050_v49, %v2582_v16  ;;  %s2169_s23 = spop %2168 }
 0x6e8   : > { %v1061_v53 = vstv %s2169_s23  ;;  %s2125_s23 = sld [smem:[#allocation2 + $0x81]] }
 0x6e9   : > { %v1063_v54 = vmul.f32 %v1061_v53, %v2582_v16  ;;  %v1064_v55 = vmul.f32 %v1062_v50, %v1062_v50 }
 0x6eb   : > { %v1065_v57 = vsub.f32 %v1063_v54, %v1064_v55 }
 0x6ed   : > { %v1066_v61 = vmax.f32 %v1065_v57, 0.0 }
 0x6ef   : > { %v1067_v62 = vadd.f32 1e-06, %v1066_v61 }
 0x6f1   : > { %2319 = vrsqrt.f32 %v1067_v62  ;;  %vm1074_vm10 = vweird.f32 %v1067_v62 }
 0x6f7   : > { %v2320_v3 = vpop.eup %2319 }
 0x6f8   : > { %v1069_v5 = vmul.f32 %v2320_v3, %v1067_v62  ;;  %vm1075_vm9 = vweird.f32 %v2320_v3 }
 0x6f9   : > { %vm1076_vm11 = vmor %vm1074_vm10, %vm1075_vm9 }
 0x6fa   : > { %v1070_v45 = vmul.f32 %v2320_v3, %v1069_v5 }
 0x6fc   : > { %v1071_v6 = vmul.f32 0.5, %v1070_v45 }
 0x6fe   : > { %v1072_v7 = vsub.f32 1.5, %v1071_v6 }
 0x700   : > { %v1073_v8 = vmul.f32 %v2320_v3, %v1072_v7 }
 0x702   : > { %v1077_v34 = vsel %vm1076_vm11, %v2320_v3, %v1073_v8 }
 0x703   : > { %v1080_v9 = vmul.f32 %v2732_v31, %v1077_v34  ;;  %v1079_v12 = vmul.f32 %v2761_v29, %v1077_v34  ;;  %v1078_v35 = vmul.f32 %v2737_v22, %v1077_v34  ;;  %v1081_v14 = vmul.f32 %v2744_v4, %v1077_v34 }
 0x705   : > { %1118 = vperm.xlu2 %2273, %v1080_v9   ;;  %1113 = vperm.xlu1 %2272, %v1079_v12   ;;  %v1082_v13 = vmul.f32 %v1078_v35, %v1062_v50  ;;  %v1083_v36 = vmul.f32 %v1079_v12, %v1062_v50  ;;  %v1084_v15 = vmul.f32 %v1080_v9, %v1062_v50 }
 0x706   : > { %v1085_v11 = vmul.f32 %v1081_v14, %v1062_v50 }
 0x707   : > { %1090 = vrot.lane.b32.xlu0 %v1082_v13, %s2414_s27  ;;  %v1211_v13 = vadd.s32 4294967294, %v2663_v39 }
 0x709   : > { %vm1212_vm12 = vcmp.ge.s32.totalorder %v1211_v13, 0 }
 0x70d   : > { %1123 = vperm.xlu2 %2273, %v1081_v14   ;;  %1171 = vperm.xlu1 %2272, %v2818_v44  }
 0x70f   : > { %1092 = vrot.lane.b32.xlu0 %v1083_v36, %s2414_s27 }
 0x715   : > { %1161 = vperm.xlu2 %2273, %v2121_v24   ;;  %2275 = vset.pattern.permute.xlu1 %v2411_v0 }
 0x716   : > { %1222 = vperm.xlu1 %2275, %v2121_v24  }
 0x717   : > { %1094 = vrot.lane.b32.xlu0 %v1084_v15, %s2414_s27  ;;  %v1253_v15 = vadd.s32 2, %v2663_v39 }
 0x719   : > { %vm1255_vm13 = vcmp.lt.s32.totalorder %v1253_v15, 128 }
 0x71d   : > { %2274 = vset.pattern.permute.xlu2 %v2415_v51 }
 0x71e   : > { %1184 = vperm.xlu2 %2274, %v2737_v22   ;;  %2277 = vset.pattern.permute.xlu1 %v2413_v21 }
 0x71f   : > { %1096 = vrot.lane.b32.xlu0 %v1085_v11, %s2414_s27  ;;  %1176 = vperm.xlu1 %2277, %v2835_v63  }
 0x726   : > { %2276 = vset.pattern.permute.xlu2 %v2411_v0 }
 0x727   : > { %1108 = vperm.xlu0 %2271, %v1078_v35   ;;  %1226 = vperm.xlu2 %2276, %v2122_v17  }
 0x728   : > { %2280 = vset.pattern.permute.xlu1 %v2416_v52 }
 0x72f   : > { %1166 = vperm.xlu0 %2271, %v2122_v17   ;;  %2278 = vset.pattern.permute.xlu2 %v2415_v51 }
 0x730   : > { %1192 = vperm.xlu2 %2278, %v2732_v31  }
 0x737   : > { %2279 = vset.pattern.permute.xlu0 %v2416_v52 }
 0x738   : > { %2283 = vset.pattern.permute.xlu2 %v2416_v52 }
 0x739   : > { %1268 = vperm.xlu2 %2283, %v2122_v17  }
 0x75f   : > { %v1119_v40 = vpop.permute.xlu2 %1118 }
 0x760   : > { %v1128_v55 = vmul.f32 %v1119_v40, %v2787_v60 }
 0x767   : > { %v1124_v37 = vpop.permute.xlu2 %1123 }
 0x768   : > { %v1129_v62 = vmul.f32 %v1124_v37, %v2798_v10 }
 0x76f   : > { %v1162_v47 = vpop.permute.xlu2 %1161 }
 0x777   : > { %v1114_v38 = vpop.permute.xlu1 %1113 }
 0x778   : > { %v1127_v49 = vmul.f32 %v1114_v38, %v2783_v58  ;;  %v1185_v60 = vpop.permute.xlu2 %1184 }
 0x779   : > { %v1091_v20 = vpop.permute.xlu0 %1090 }
 0x77a   : > { %v1102_v19 = vsub.f32 %v2737_v22, %v1091_v20 }
 0x77c   : > { %1132 = vperm.xlu0 %2279, %v1102_v19  }
 0x77f   : > { %v1172_v23 = vpop.permute.xlu1 %1171 }
 0x781   : > { %v1093_v26 = vpop.permute.xlu0 %1092  ;;  %v1227_v10 = vpop.permute.xlu2 %1226 }
 0x782   : > { %v1103_v25 = vsub.f32 %v2761_v29, %v1093_v26 }
 0x784   : > { %1137 = vperm.xlu1 %2280, %v1103_v25  }
 0x788   : > { %v1223_v1 = vpop.permute.xlu1 %1222 }
 0x789   : > { %v1095_v27 = vpop.permute.xlu0 %1094 }
 0x78a   : > { %v1104_v28 = vsub.f32 %v2732_v31, %v1095_v27  ;;  %v1193_v45 = vpop.permute.xlu2 %1192 }
 0x78c   : > { %1142 = vperm.xlu0 %2279, %v1104_v28  }
 0x791   : > { %v1097_v32 = vpop.permute.xlu0 %1096  ;;  %v1177_v41 = vpop.permute.xlu1 %1176 }
 0x792   : > { %v1105_v33 = vsub.f32 %v2744_v4, %v1097_v32 }
 0x793   : > { %v1269_v6 = vpop.permute.xlu2 %1268 }
 0x794   : > { %2281 = vset.pattern.permute.xlu0 %v2411_v0  ;;  %1147 = vperm.xlu1 %2280, %v1105_v33  }
 0x795   : > { %1230 = vperm.xlu0 %2281, %v2818_v44  }
 0x799   : > { %v1109_v30 = vpop.permute.xlu0 %1108 }
 0x79a   : > { %v1126_v42 = vmul.f32 %v1109_v30, %v2785_v59 }
 0x79c   : > { %1264 = vperm.xlu1 %2280, %v2121_v24  }
 0x79d   : > { %2282 = vset.pattern.permute.xlu0 %v2415_v51 }
 0x79e   : > { %1188 = vperm.xlu0 %2282, %v2761_v29  }
 0x7a1   : > { %v1167_v2 = vpop.permute.xlu0 %1166 }
 0x7a4   : > { %2284 = vset.pattern.permute.xlu1 %v2411_v0 }
 0x7ee   : > { %v1133_v43 = vpop.permute.xlu0 %1132 }
 0x7ef   : > { %v1150_v46 = vadd.f32 %v1133_v43, %v1126_v42 }
 0x7f1   : > { %1203 = vrot.lane.b32.xlu1 %v1150_v46, %s2420_s21  ;;  %v1179_v48 = vmul.f32 %v1162_v47, %v1150_v46 }
 0x7f3   : > { %v1199_v28 = vadd.f32 %v1185_v60, %v1179_v48 }
 0x7f6   : > { %v1138_v50 = vpop.permute.xlu1 %1137 }
 0x7f7   : > { %v1151_v53 = vadd.f32 %v1138_v50, %v1127_v49  ;;  %v1292_v49 = vstv %s2125_s23 }
 0x7f9   : > { %1205 = vrot.lane.b32.xlu2 %v1151_v53, %s2420_s21  ;;  %1247 = vrot.lane.b32.xlu0 %v1151_v53, %s2421_s22  ;;  %v1180_v54 = vmul.f32 %v1167_v2, %v1151_v53 }
 0x7fe   : > { %v1143_v57 = vpop.permute.xlu0 %1142 }
 0x7ff   : > { %v1152_v61 = vadd.f32 %v1143_v57, %v1128_v55 }
 0x801   : > { %1196 = vperm.xlu0 %2282, %v2744_v4   ;;  %1245 = vrot.lane.b32.xlu2 %v1150_v46, %s2421_s22  ;;  %v1181_v59 = vmul.f32 %v1172_v23, %v1152_v61 }
 0x802   : > { %1207 = vrot.lane.b32.xlu1 %v1152_v61, %s2420_s21 }
 0x803   : > { %v1201_v32 = vadd.f32 %v1193_v45, %v1181_v59 }
 0x806   : > { %v1148_v3 = vpop.permute.xlu1 %1147 }
 0x807   : > { %v1153_v5 = vadd.f32 %v1148_v3, %v1129_v62  ;;  %v1231_v34 = vpop.permute.xlu0 %1230 }
 0x809   : > { %1272 = vperm.xlu2 %2283, %v2818_v44   ;;  %v2858_v58 = vmul.f32 %v1177_v41, %v1153_v5  ;;  %2286 = vset.pattern.permute.xlu0 %v2418_v18 }
 0x80a   : > { %1234 = vperm.xlu1 %2284, %v2835_v63  }
 0x80e   : > { %v1265_v8 = vpop.permute.xlu1 %1264 }
 0x810   : > { %v1189_v35 = vpop.permute.xlu0 %1188 }
 0x811   : > { %1249 = vrot.lane.b32.xlu2 %v1152_v61, %s2421_s22  ;;  %v1200_v33 = vadd.f32 %v1189_v35, %v1180_v54 }
 0x812   : > { %1209 = vrot.lane.b32.xlu1 %v1153_v5, %s2420_s21 }
 0x813   : > { %2287 = vset.pattern.permute.xlu1 %v2419_v56 }
 0x819   : > { %1276 = vperm.xlu2 %2283, %v2835_v63  }
 0x81a   : > { %1251 = vrot.lane.b32.xlu1 %v1153_v5, %s2421_s22 }
 0x821   : > { %2285 = vset.pattern.permute.xlu2 %v2418_v18 }
 0x853   : > { %v1206_v7 = vpop.permute.xlu2 %1205 }
 0x854   : > { %v1218_v44 = vsel %vm1212_vm12, %v1206_v7, 0.0 }
 0x855   : > { %v1238_v19 = vmul.f32 %v1227_v10, %v1218_v44 }
 0x857   : > { %v1242_v40 = vadd.f32 %v1238_v19, %v1200_v33 }
 0x85b   : > { %v1246_v9 = vpop.permute.xlu2 %1245 }
 0x85c   : > { %v1259_v23 = vsel %vm1255_vm13, %v1246_v9, 0.0 }
 0x85d   : > { %v1279_v41 = vmul.f32 %v1265_v8, %v1259_v23 }
 0x863   : > { %v1204_v12 = vpop.permute.xlu1 %1203  ;;  %v1273_v14 = vpop.permute.xlu2 %1272 }
 0x864   : > { %v1217_v17 = vsel %vm1212_vm12, %v1204_v12, 0.0 }
 0x865   : > { %v1237_v26 = vmul.f32 %v1223_v1, %v1217_v17 }
 0x867   : > { %v1241_v2 = vadd.f32 %v1237_v26, %v1199_v28 }
 0x869   : > { %v1283_v47 = vadd.f32 %v1279_v41, %v1241_v2 }
 0x86b   : > { %v1248_v11 = vpop.permute.xlu0 %1247  ;;  %v1250_v25 = vpop.permute.xlu2 %1249  ;;  %v1293_v54 = vmul.f32 %v1292_v49, %v1283_v47  ;;  %vm1288_vm15 = vcmp.ge.f32.partialorder %v1283_v47, 0.0 }
 0x86c   : > { %v1260_v20 = vsel %vm1255_vm13, %v1248_v11, 0.0  ;;  %v1261_v30 = vsel %vm1255_vm13, %v1250_v25, 0.0 }
 0x86d   : > { %v1280_v38 = vmul.f32 %v1269_v6, %v1260_v20  ;;  %v1281_v42 = vmul.f32 %v1273_v14, %v1261_v30  ;;  %v2878_v60 = vsel %vm1288_vm15, %v1283_v47, %v1293_v54 }
 0x86f   : > { %v1284_v43 = vadd.f32 %v1280_v38, %v1242_v40 }
 0x871   : > { %v1294_v48 = vmul.f32 %v1292_v49, %v1284_v43  ;;  %vm1289_vm14 = vcmp.ge.f32.partialorder %v1284_v43, 0.0 }
 0x873   : > { %v1197_v53 = vpop.permute.xlu0 %1196  ;;  %v2874_v61 = vsel %vm1289_vm14, %v1284_v43, %v1294_v48  ;;  %v1277_v3 = vpop.permute.xlu2 %1276 }
 0x874   : > { %v1208_v36 = vpop.permute.xlu1 %1207  ;;  %v1202_v59 = vadd.f32 %v1197_v53, %v2858_v58  ;;  %v1311_v7 = vmul.f32 %v2874_v61, %v2874_v61  ;;  %v1301_v58 = vadd.f32 %v2874_v61, %v2878_v60 }
 0x875   : > { %v1219_v24 = vsel %vm1212_vm12, %v1208_v36, 0.0 }
 0x876   : > { %v1239_v27 = vmul.f32 %v1231_v34, %v1219_v24  ;;  %v1310_v34 = vmul.f32 %v2878_v60, %v2878_v60 }
 0x878   : > { %v1243_v37 = vadd.f32 %v1239_v27, %v1201_v32  ;;  %v1314_v35 = vadd.f32 %v1311_v7, %v1310_v34 }
 0x87a   : > { %v1285_v1 = vadd.f32 %v1281_v42, %v1243_v37 }
 0x87c   : > { %v1235_v63 = vpop.permute.xlu1 %1234  ;;  %v1295_v55 = vmul.f32 %v1292_v49, %v1285_v1  ;;  %vm1290_vm1 = vcmp.ge.f32.partialorder %v1285_v1, 0.0 }
 0x87e   : > { %v2880_v10 = vsel %vm1290_vm1, %v1285_v1, %v1295_v55 }
 0x87f   : > { %v1312_v9 = vmul.f32 %v2880_v10, %v2880_v10  ;;  %v1302_v13 = vadd.f32 %v1301_v58, %v2880_v10 }
 0x881   : > { %v1315_v11 = vadd.f32 %v1314_v35, %v1312_v9 }
 0x884   : > { %v1210_v46 = vpop.permute.xlu1 %1209 }
 0x885   : > { %v1220_v50 = vsel %vm1212_vm12, %v1210_v46, 0.0 }
 0x886   : > { %v1240_v57 = vmul.f32 %v1235_v63, %v1220_v50 }
 0x888   : > { %v1244_v45 = vadd.f32 %v1240_v57, %v1202_v59 }
 0x88c   : > { %v1252_v62 = vpop.permute.xlu1 %1251 }
 0x88d   : > { %v1262_v5 = vsel %vm1255_vm13, %v1252_v62, 0.0 }
 0x88e   : > { %v1282_v6 = vmul.f32 %v1277_v3, %v1262_v5 }
 0x890   : > { %v1286_v8 = vadd.f32 %v1282_v6, %v1244_v45 }
 0x892   : > { %vm1291_vm2 = vcmp.ge.f32.partialorder %v1286_v8, 0.0  ;;  %v1296_v12 = vmul.f32 %v1292_v49, %v1286_v8 }
 0x894   : > { %v2891_v14 = vsel %vm1291_vm2, %v1286_v8, %v1296_v12 }
 0x895   : > { %v1313_v36 = vmul.f32 %v2891_v14, %v2891_v14  ;;  %v1303_v15 = vadd.f32 %v1302_v13, %v2891_v14 }
 0x897   : > { %v1304_v44 = vrot.slane %v1303_v15, 4  ;;  %v1316_v17 = vadd.f32 %v1315_v11, %v1313_v36 }
 0x899   : > { %v1305_v24 = vadd.f32 %v1304_v44, %v1303_v15  ;;  %v1317_v63 = vrot.slane %v1316_v17, 4 }
 0x89b   : > { %v1306_v20 = vrot.slane %v1305_v24, 2  ;;  %v1318_v19 = vadd.f32 %v1317_v63, %v1316_v17 }
 0x89d   : > { %v1307_v26 = vadd.f32 %v1306_v20, %v1305_v24  ;;  %v1319_v25 = vrot.slane %v1318_v19, 2 }
 0x89f   : > { %v1308_v27 = vrot.slane %v1307_v26, 1  ;;  %v1320_v28 = vadd.f32 %v1319_v25, %v1318_v19 }
 0x8a1   : > { %v1309_v32 = vadd.f32 %v1308_v27, %v1307_v26  ;;  %v1321_v33 = vrot.slane %v1320_v28, 1 }
 0x8a3   : > { %v1323_v38 = vsel %vm479_vm5, %v1309_v32, 0.0  ;;  %v1322_v23 = vadd.f32 %v1321_v33, %v1320_v28 }
 0x8a4   : > { %1324 = vadd.xlane.f32.xlu0 %v1323_v38 }
 0x8a5   : > { %v1334_v30 = vsel %vm479_vm5, %v1322_v23, 0.0 }
 0x8a6   : > { %1335 = vadd.xlane.f32.xlu1 %v1334_v30 }
 0x917   : > { %v1325_v40 = vpop.xlane.xlu0 %1324 }
 0x918   : > { %v1326_v2 = vrot.slane %v1325_v40, 4 }
 0x919   : > { %v1336_v37 = vpop.xlane.xlu1 %1335 }
 0x91a   : > { %v1327_v41 = vadd.f32 %v1326_v2, %v1325_v40  ;;  %v1337_v42 = vrot.slane %v1336_v37, 4 }
 0x91c   : > { %v1328_v43 = vrot.slane %v1327_v41, 2  ;;  %v1338_v46 = vadd.f32 %v1337_v42, %v1336_v37  ;;  %v2927_v42 = vld [vmem:[%s3152_s6 + $0x50] sm:$0xff] }
 0x91e   : > { %v1339_v47 = vrot.slane %v1338_v46, 2  ;;  %v1329_v1 = vadd.f32 %v1328_v43, %v1327_v41 }
 0x920   : > { %v1330_v49 = vrot.slane %v1329_v1, 1  ;;  %v1340_v50 = vadd.f32 %v1339_v47, %v1338_v46 }
 0x922   : > { %v1331_v48 = vadd.f32 %v1330_v49, %v1329_v1  ;;  %v1341_v53 = vrot.slane %v1340_v50, 1 }
 0x924   : > { %2170 = vpush %v1331_v48  ;;  %v1342_v54 = vadd.f32 %v1341_v53, %v1340_v50  ;;  %v2126_v48 = vld [vmem:[%s3149_s3 + $0x20] sm:$0xff]  ;;  %v2129_v53 = vld [vmem:[%s3149_s3 + $0x38] sm:$0xff] }
 0x926   : > { %2172 = vpush %v1342_v54 }
 0x955   : > { %s2171_s24 = spop %2170 }
 0x956   : > { %v1333_v55 = vstv %s2171_s24 }
 0x957   : > { %v1345_v57 = vmul.f32 %v1333_v55, %v2582_v16  ;;  %s2173_s25 = spop %2172 }
 0x958   : > { %v1344_v59 = vstv %s2173_s25 }
 0x959   : > { %v1346_v62 = vmul.f32 %v1344_v59, %v2582_v16  ;;  %v1347_v3 = vmul.f32 %v1345_v57, %v1345_v57 }
 0x95b   : > { %v1348_v5 = vsub.f32 %v1346_v62, %v1347_v3 }
 0x95d   : > { %v1349_v45 = vmax.f32 %v1348_v5, 0.0 }
 0x95f   : > { %v1350_v6 = vadd.f32 1e-06, %v1349_v45  ;;  %v1513_v45 = vstv %s2138_s17  ;;  %s2422_s17 = smov 124  }
 0x961   : > { %2321 = vrsqrt.f32 %v1350_v6  ;;  %vm1357_vm6 = vweird.f32 %v1350_v6 }
 0x967   : > { %v2322_v7 = vpop.eup %2321 }
 0x968   : > { %v1352_v8 = vmul.f32 %v2322_v7, %v1350_v6  ;;  %vm1358_vm3 = vweird.f32 %v2322_v7 }
 0x969   : > { %vm1359_vm7 = vmor %vm1357_vm6, %vm1358_vm3 }
 0x96a   : > { %v1353_v34 = vmul.f32 %v2322_v7, %v1352_v8 }
 0x96c   : > { %v1354_v58 = vmul.f32 0.5, %v1353_v34 }
 0x96e   : > { %v1355_v9 = vsub.f32 1.5, %v1354_v58 }
 0x970   : > { %v1356_v12 = vmul.f32 %v2322_v7, %v1355_v9 }
 0x972   : > { %v1360_v35 = vsel %vm1359_vm7, %v2322_v7, %v1356_v12 }
 0x973   : > { %v1363_v13 = vmul.f32 %v2732_v31, %v1360_v35  ;;  %v1364_v36 = vmul.f32 %v2744_v4, %v1360_v35  ;;  %v1362_v44 = vmul.f32 %v2761_v29, %v1360_v35  ;;  %v1361_v24 = vmul.f32 %v2737_v22, %v1360_v35 }
 0x975   : > { %1401 = vperm.xlu0 %2286, %v1363_v13   ;;  %v1368_v15 = vmul.f32 %v1364_v36, %v1345_v57  ;;  %v1367_v11 = vmul.f32 %v1363_v13, %v1345_v57  ;;  %v1366_v17 = vmul.f32 %v1362_v44, %v1345_v57  ;;  %v1365_v63 = vmul.f32 %v1361_v24, %v1345_v57 }
 0x977   : > { %1379 = vrot.lane.b32.xlu2 %v1368_v15, %s2414_s27 }
 0x97d   : > { %2291 = vset.pattern.permute.xlu0 %v2411_v0 }
 0x97e   : > { %1459 = vperm.xlu0 %2291, %v2927_v42  }
 0x97f   : > { %1377 = vrot.lane.b32.xlu2 %v1367_v11, %s2414_s27 }
 0x986   : > { %2293 = vset.pattern.permute.xlu0 %v2413_v21 }
 0x987   : > { %1375 = vrot.lane.b32.xlu2 %v1366_v17, %s2414_s27 }
 0x98f   : > { %1373 = vrot.lane.b32.xlu2 %v1365_v63, %s2414_s27 }
 0x997   : > { %1406 = vperm.xlu2 %2285, %v1364_v36  }
 0x99f   : > { %1396 = vperm.xlu2 %2285, %v1362_v44  }
 0x9a7   : > { %1391 = vperm.xlu2 %2285, %v1361_v24  }
 0x9af   : > { %2288 = vset.pattern.permute.xlu2 %v2419_v56 }
 0x9d1   : > { %v1380_v20 = vpop.permute.xlu2 %1379 }
 0x9d2   : > { %v1388_v19 = vsub.f32 %v2744_v4, %v1380_v20 }
 0x9d4   : > { %1430 = vperm.xlu1 %2287, %v1388_v19  }
 0x9d9   : > { %v1378_v26 = vpop.permute.xlu2 %1377 }
 0x9da   : > { %v1387_v25 = vsub.f32 %v2732_v31, %v1378_v26 }
 0x9dc   : > { %1425 = vperm.xlu2 %2288, %v1387_v25  }
 0x9e1   : > { %v1376_v27 = vpop.permute.xlu2 %1375 }
 0x9e2   : > { %v1386_v28 = vsub.f32 %v2761_v29, %v1376_v27 }
 0x9e4   : > { %1420 = vperm.xlu1 %2287, %v1386_v28  }
 0x9e7   : > { %v1402_v30 = vpop.permute.xlu0 %1401 }
 0x9e8   : > { %v1411_v37 = vmul.f32 %v1402_v30, %v2880_v10  ;;  %v2932_v10 = vld [vmem:[%s3152_s6 + $0x58] sm:$0xff] }
 0x9e9   : > { %v1374_v32 = vpop.permute.xlu2 %1373 }
 0x9ea   : > { %v1385_v33 = vsub.f32 %v2737_v22, %v1374_v32  ;;  %v2921_v22 = vld [vmem:[%s3152_s6 + $0x40] sm:$0xff] }
 0x9ec   : > { %1415 = vperm.xlu2 %2288, %v1385_v33   ;;  %2289 = vset.pattern.permute.xlu1 %v2411_v0 }
 0x9ed   : > { %1449 = vperm.xlu1 %2289, %v2921_v22  }
 0x9f0   : > { %v1460_v3 = vpop.permute.xlu0 %1459 }
 0x9f1   : > { %v1407_v38 = vpop.permute.xlu2 %1406 }
 0x9f2   : > { %v1412_v40 = vmul.f32 %v1407_v38, %v2891_v14  ;;  %v2937_v14 = vld [vmem:[%s3152_s6 + $0x48] sm:$0xff] }
 0x9f4   : > { %2290 = vset.pattern.permute.xlu2 %v2411_v0 }
 0x9f5   : > { %1464 = vperm.xlu1 %2289, %v2932_v10   ;;  %1454 = vperm.xlu2 %2290, %v2937_v14  }
 0x9f9   : > { %v1397_v23 = vpop.permute.xlu2 %1396 }
 0x9fa   : > { %v1410_v43 = vmul.f32 %v1397_v23, %v2874_v61  ;;  %v2127_v61 = vld [vmem:[%s3149_s3 + $0x28] sm:$0xff] }
 0x9fd   : > { %2294 = vset.pattern.permute.xlu1 %v2413_v21  ;;  %2292 = vset.pattern.permute.xlu2 %v2413_v21 }
 0xa01   : > { %v1392_v4 = vpop.permute.xlu2 %1391 }
 0xa02   : > { %v1409_v1 = vmul.f32 %v1392_v4, %v2878_v60  ;;  %v2128_v60 = vld [vmem:[%s3149_s3 + $0x30] sm:$0xff] }
 0xa36   : > { %v1426_v31 = vpop.permute.xlu2 %1425 }
 0xa37   : > { %v1435_v41 = vadd.f32 %v1426_v31, %v1411_v37 }
 0xa46   : > { %v1431_v2 = vpop.permute.xlu1 %1430  ;;  %v1416_v46 = vpop.permute.xlu2 %1415 }
 0xa47   : > { %v1436_v29 = vadd.f32 %v1431_v2, %v1412_v40  ;;  %v1433_v50 = vadd.f32 %v1416_v46, %v1409_v1 }
 0xa49   : > { %1491 = vmatpush.msra.mxu3 %v1436_v29 }
 0xa4b   : > { %1492 = vmatpush.msra.mxu3 %v1435_v41 }
 0xa4f   : > { %v1455_v57 = vpop.permute.xlu2 %1454 }
 0xa56   : > { %v1421_v47 = vpop.permute.xlu1 %1420 }
 0xa57   : > { %v1434_v49 = vadd.f32 %v1421_v47, %v1410_v43 }
 0xa59   : > { %1493 = vmatpush.msra.mxu3 %v1434_v49 }
 0xa5b   : > { %1494 = vmatpush.msra.mxu3 %v1433_v50 }
 0xa5c   : > { %2134 = vmatmul.msk.f32.vlgmr.msra.gmra.mxu3 %vm901_vm4, %v2126_v48 }
 0xa5f   : > { %v1450_v59 = vpop.permute.xlu1 %1449 }
 0xa64   : > { %2135 = vmatmul.msk.f32.gmra.mxu3 %vm901_vm4, %v2127_v61 }
 0xa67   : > { %v1465_v36 = vpop.permute.xlu1 %1464 }
 0xa6c   : > { %2136 = vmatmul.msk.f32.gmra.mxu3 %vm901_vm4, %v2128_v60 }
 0xa74   : > { %2137 = vmatmul.msk.f32.gmra.mxu3 %vm901_vm4, %v2129_v53 }
 0xadf   : > { %v1496_v54 = vpop.f32.mrf.mxu3 }
 0xae0   : > { %v1497_v5 = vadd.f32 %v1496_v54, %v1450_v59 }
 0xae2   : > { %v1514_v34 = vmul.f32 %v1513_v45, %v1497_v5  ;;  %vm1509_vm0 = vcmp.ge.f32.partialorder %v1497_v5, 0.0 }
 0xae4   : > { %v2965_v12 = vsel %vm1509_vm0, %v1497_v5, %v1514_v34 }
 0xae5   : > { %v1531_v44 = vmul.f32 %v2965_v12, %v2965_v12 }
 0xae7   : > { %v1499_v55 = vpop.f32.mrf.mxu3 }
 0xae8   : > { %v1500_v62 = vadd.f32 %v1499_v55, %v1455_v57 }
 0xaea   : > { %v1515_v7 = vmul.f32 %v1513_v45, %v1500_v62  ;;  %vm1510_vm8 = vcmp.ge.f32.partialorder %v1500_v62, 0.0 }
 0xaec   : > { %v2963_v9 = vsel %vm1510_vm8, %v1500_v62, %v1515_v7 }
 0xaed   : > { %v1532_v13 = vmul.f32 %v2963_v9, %v2963_v9  ;;  %v1522_v17 = vadd.f32 %v2963_v9, %v2965_v12 }
 0xaef   : > { %v1502_v6 = vpop.f32.mrf.mxu3  ;;  %v1535_v20 = vadd.f32 %v1532_v13, %v1531_v44 }
 0xaf0   : > { %v1503_v8 = vadd.f32 %v1502_v6, %v1460_v3 }
 0xaf2   : > { %v1516_v58 = vmul.f32 %v1513_v45, %v1503_v8  ;;  %vm1511_vm9 = vcmp.ge.f32.partialorder %v1503_v8, 0.0 }
 0xaf4   : > { %v2967_v35 = vsel %vm1511_vm9, %v1503_v8, %v1516_v58 }
 0xaf5   : > { %v1533_v24 = vmul.f32 %v2967_v35, %v2967_v35  ;;  %v1523_v19 = vadd.f32 %v1522_v17, %v2967_v35 }
 0xaf7   : > { %v1505_v15 = vpop.f32.mrf.mxu3  ;;  %v1536_v25 = vadd.f32 %v1535_v20, %v1533_v24 }
 0xaf8   : > { %v1506_v11 = vadd.f32 %v1505_v15, %v1465_v36 }
 0xafa   : > { %vm1512_vm10 = vcmp.ge.f32.partialorder %v1506_v11, 0.0  ;;  %v1517_v63 = vmul.f32 %v1513_v45, %v1506_v11 }
 0xafc   : > { %v2978_v26 = vsel %vm1512_vm10, %v1506_v11, %v1517_v63 }
 0xafd   : > { %v1524_v27 = vadd.f32 %v1523_v19, %v2978_v26  ;;  %v1534_v28 = vmul.f32 %v2978_v26, %v2978_v26 }
 0xaff   : > { %v1525_v32 = vrot.slane %v1524_v27, 4  ;;  %v1537_v33 = vadd.f32 %v1536_v25, %v1534_v28 }
 0xb01   : > { %v1526_v38 = vadd.f32 %v1525_v32, %v1524_v27  ;;  %v1538_v23 = vrot.slane %v1537_v33, 4 }
 0xb03   : > { %v1527_v4 = vrot.slane %v1526_v38, 2  ;;  %v1539_v30 = vadd.f32 %v1538_v23, %v1537_v33 }
 0xb05   : > { %v1528_v40 = vadd.f32 %v1527_v4, %v1526_v38  ;;  %v1540_v31 = vrot.slane %v1539_v30, 2  ;;  %v2139_v4 = vld [vmem:[%s3153_s7 + $0x40] sm:$0xff] }
 0xb07   : > { %v1529_v2 = vrot.slane %v1528_v40, 1  ;;  %v1541_v37 = vadd.f32 %v1540_v31, %v1539_v30  ;;  %v2140_v30 = vld [vmem:[%s3153_s7 + $0x48] sm:$0xff]  ;;  %v2142_v31 = vld [vmem:[%s3153_s7 + $0x58] sm:$0xff] }
 0xb09   : > { %v1530_v29 = vadd.f32 %v1529_v2, %v1528_v40  ;;  %v1542_v41 = vrot.slane %v1541_v37, 1  ;;  %v2141_v40 = vld [vmem:[%s3153_s7 + $0x50] sm:$0xff] }
 0xb0b   : > { %v1544_v43 = vsel %vm479_vm5, %v1530_v29, 0.0  ;;  %v1543_v46 = vadd.f32 %v1542_v41, %v1541_v37 }
 0xb0c   : > { %1545 = vadd.xlane.f32.xlu2 %v1544_v43 }
 0xb0d   : > { %v1555_v47 = vsel %vm479_vm5, %v1543_v46, 0.0 }
 0xb0e   : > { %1556 = vadd.xlane.f32.xlu1 %v1555_v47 }
 0xb7f   : > { %v1546_v1 = vpop.xlane.xlu2 %1545 }
 0xb80   : > { %v1547_v49 = vrot.slane %v1546_v1, 4 }
 0xb81   : > { %v1557_v50 = vpop.xlane.xlu1 %1556 }
 0xb82   : > { %v1548_v48 = vadd.f32 %v1547_v49, %v1546_v1  ;;  %v1558_v61 = vrot.slane %v1557_v50, 4 }
 0xb84   : > { %v1549_v60 = vrot.slane %v1548_v48, 2  ;;  %v1559_v53 = vadd.f32 %v1558_v61, %v1557_v50 }
 0xb86   : > { %v1560_v54 = vrot.slane %v1559_v53, 2  ;;  %v1550_v55 = vadd.f32 %v1549_v60, %v1548_v48 }
 0xb88   : > { %v1551_v57 = vrot.slane %v1550_v55, 1  ;;  %v1561_v59 = vadd.f32 %v1560_v54, %v1559_v53 }
 0xb8a   : > { %v1552_v62 = vadd.f32 %v1551_v57, %v1550_v55  ;;  %v1562_v3 = vrot.slane %v1561_v59, 1 }
 0xb8c   : > { %2174 = vpush %v1552_v62  ;;  %v1563_v5 = vadd.f32 %v1562_v3, %v1561_v59 }
 0xb8e   : > { %2176 = vpush %v1563_v5 }
 0xbbd   : > { %s2175_s21 = spop %2174 }
 0xbbe   : > { %v1554_v45 = vstv %s2175_s21  ;;  %s2423_s21 = smov 4  }
 0xbbf   : > { %v1566_v6 = vmul.f32 %v1554_v45, %v2582_v16  ;;  %s2177_s22 = spop %2176 }
 0xbc0   : > { %v1565_v7 = vstv %s2177_s22  ;;  %s2143_s22 = sld [smem:[#allocation2 + $0x101]] }
 0xbc1   : > { %v1567_v8 = vmul.f32 %v1565_v7, %v2582_v16  ;;  %v1568_v34 = vmul.f32 %v1566_v6, %v1566_v6 }
 0xbc3   : > { %v1569_v58 = vsub.f32 %v1567_v8, %v1568_v34 }
 0xbc5   : > { %v1570_v13 = vmax.f32 %v1569_v58, 0.0 }
 0xbc7   : > { %v1571_v36 = vadd.f32 1e-06, %v1570_v13 }
 0xbc9   : > { %2323 = vrsqrt.f32 %v1571_v36  ;;  %vm1578_vm12 = vweird.f32 %v1571_v36 }
 0xbcf   : > { %v2324_v15 = vpop.eup %2323 }
 0xbd0   : > { %v1573_v11 = vmul.f32 %v2324_v15, %v1571_v36  ;;  %vm1579_vm11 = vweird.f32 %v2324_v15 }
 0xbd1   : > { %vm1580_vm13 = vmor %vm1578_vm12, %vm1579_vm11 }
 0xbd2   : > { %v1574_v44 = vmul.f32 %v2324_v15, %v1573_v11 }
 0xbd4   : > { %v1575_v17 = vmul.f32 0.5, %v1574_v44 }
 0xbd6   : > { %v1576_v24 = vsub.f32 1.5, %v1575_v17 }
 0xbd8   : > { %v1577_v63 = vmul.f32 %v2324_v15, %v1576_v24 }
 0xbda   : > { %v1581_v20 = vsel %vm1580_vm13, %v2324_v15, %v1577_v63 }
 0xbdb   : > { %v1584_v19 = vmul.f32 %v2927_v42, %v1581_v20  ;;  %v1582_v25 = vmul.f32 %v2921_v22, %v1581_v20  ;;  %v1583_v28 = vmul.f32 %v2937_v14, %v1581_v20  ;;  %v1585_v32 = vmul.f32 %v2932_v10, %v1581_v20 }
 0xbdd   : > { %1622 = vperm.xlu1 %2294, %v1584_v19   ;;  %1612 = vperm.xlu2 %2292, %v1582_v25   ;;  %v1586_v27 = vmul.f32 %v1582_v25, %v1566_v6  ;;  %v1587_v33 = vmul.f32 %v1583_v28, %v1566_v6  ;;  %v1588_v38 = vmul.f32 %v1584_v19, %v1566_v6 }
 0xbde   : > { %v1589_v23 = vmul.f32 %v1585_v32, %v1566_v6 }
 0xbdf   : > { %1594 = vrot.lane.b32.xlu0 %v1586_v27, %s2414_s27 }
 0xbe5   : > { %1627 = vperm.xlu2 %2292, %v1585_v32   ;;  %1675 = vperm.xlu1 %2294, %v2141_v40  }
 0xbe7   : > { %1596 = vrot.lane.b32.xlu0 %v1587_v33, %s2414_s27 }
 0xbed   : > { %1665 = vperm.xlu2 %2292, %v2139_v4   ;;  %2296 = vset.pattern.permute.xlu1 %v2411_v0 }
 0xbee   : > { %1726 = vperm.xlu1 %2296, %v2139_v4  }
 0xbef   : > { %1598 = vrot.lane.b32.xlu0 %v1588_v38, %s2414_s27 }
 0xbf5   : > { %2295 = vset.pattern.permute.xlu2 %v2415_v51 }
 0xbf6   : > { %1688 = vperm.xlu2 %2295, %v2921_v22   ;;  %2298 = vset.pattern.permute.xlu1 %v2413_v21 }
 0xbf7   : > { %1600 = vrot.lane.b32.xlu0 %v1589_v23, %s2414_s27  ;;  %1680 = vperm.xlu1 %2298, %v2142_v31  }
 0xbfe   : > { %2297 = vset.pattern.permute.xlu2 %v2411_v0 }
 0xbff   : > { %1617 = vperm.xlu0 %2293, %v1583_v28   ;;  %1730 = vperm.xlu2 %2297, %v2140_v30   ;;  %v1757_v28 = vadd.s32 4, %v2663_v39 }
 0xc00   : > { %2304 = vset.pattern.permute.xlu1 %v2416_v52 }
 0xc01   : > { %vm1759_vm15 = vcmp.lt.s32.totalorder %v1757_v28, 128 }
 0xc07   : > { %1670 = vperm.xlu0 %2293, %v2140_v30   ;;  %2299 = vset.pattern.permute.xlu2 %v2415_v51 }
 0xc08   : > { %1696 = vperm.xlu2 %2299, %v2927_v42  }
 0xc0f   : > { %2300 = vset.pattern.permute.xlu0 %v2416_v52 }
 0xc10   : > { %2301 = vset.pattern.permute.xlu2 %v2416_v52 }
 0xc37   : > { %v1613_v52 = vpop.permute.xlu2 %1612 }
 0xc38   : > { %v1630_v3 = vmul.f32 %v1613_v52, %v2965_v12 }
 0xc3f   : > { %v1628_v1 = vpop.permute.xlu2 %1627 }
 0xc40   : > { %v1633_v12 = vmul.f32 %v1628_v1, %v2978_v26  ;;  %v1715_v26 = vadd.s32 4294967292, %v2663_v39 }
 0xc42   : > { %vm1716_vm14 = vcmp.ge.s32.totalorder %v1715_v26, 0 }
 0xc47   : > { %v1666_v49 = vpop.permute.xlu2 %1665 }
 0xc50   : > { %v3025_v50 = vpop.permute.xlu2 %1688 }
 0xc51   : > { %v1595_v2 = vpop.permute.xlu0 %1594 }
 0xc52   : > { %v1606_v37 = vsub.f32 %v2921_v22, %v1595_v2 }
 0xc54   : > { %1636 = vperm.xlu0 %2300, %v1606_v37  }
 0xc59   : > { %v1597_v29 = vpop.permute.xlu0 %1596  ;;  %v3027_v48 = vpop.permute.xlu2 %1730 }
 0xc5a   : > { %v1607_v41 = vsub.f32 %v2937_v14, %v1597_v29 }
 0xc5c   : > { %1641 = vperm.xlu2 %2301, %v1607_v41  }
 0xc61   : > { %v1599_v43 = vpop.permute.xlu0 %1598 }
 0xc62   : > { %v1608_v46 = vsub.f32 %v2927_v42, %v1599_v43  ;;  %v1697_v61 = vpop.permute.xlu2 %1696 }
 0xc64   : > { %1646 = vperm.xlu0 %2300, %v1608_v46   ;;  %1772 = vperm.xlu2 %2301, %v2140_v30  }
 0xc69   : > { %v1601_v21 = vpop.permute.xlu0 %1600 }
 0xc6a   : > { %v1609_v47 = vsub.f32 %v2932_v10, %v1601_v21 }
 0xc6c   : > { %2302 = vset.pattern.permute.xlu0 %v2411_v0  ;;  %1651 = vperm.xlu1 %2304, %v1609_v47  }
 0xc6d   : > { %1734 = vperm.xlu0 %2302, %v2141_v40  }
 0xc71   : > { %v1618_v60 = vpop.permute.xlu0 %1617 }
 0xc72   : > { %v1631_v53 = vmul.f32 %v1618_v60, %v2963_v9 }
 0xc74   : > { %1768 = vperm.xlu1 %2304, %v2139_v4  }
 0xc75   : > { %2303 = vset.pattern.permute.xlu0 %v2415_v51  ;;  %v1623_v51 = vpop.permute.xlu1 %1622 }
 0xc76   : > { %1692 = vperm.xlu0 %2303, %v2937_v14   ;;  %v1632_v7 = vmul.f32 %v1623_v51, %v2967_v35 }
 0xc79   : > { %v1671_v55 = vpop.permute.xlu0 %1670 }
 0xc7c   : > { %2305 = vset.pattern.permute.xlu1 %v2411_v0 }
 0xc7d   : > { %v1676_v62 = vpop.permute.xlu1 %1675 }
 0xc85   : > { %v1727_v9 = vpop.permute.xlu1 %1726 }
 0xc8d   : > { %v1681_v6 = vpop.permute.xlu1 %1680 }
 0xcb6   : > { %v1642_v54 = vpop.permute.xlu2 %1641 }
 0xcb7   : > { %v1655_v57 = vadd.f32 %v1642_v54, %v1631_v53  ;;  %v1796_v54 = vstv %s2143_s22 }
 0xcb9   : > { %v3030_v59 = vmul.f32 %v1671_v55, %v1655_v57  ;;  %1751 = vrot.lane.b32.xlu0 %v1655_v57, %s2422_s17  ;;  %1709 = vrot.lane.b32.xlu2 %v1655_v57, %s2423_s21 }
 0xcbe   : > { %v1773_v35 = vpop.permute.xlu2 %1772 }
 0xcc1   : > { %1700 = vperm.xlu0 %2303, %v2932_v10  }
 0xcc6   : > { %v1637_v5 = vpop.permute.xlu0 %1636 }
 0xcc7   : > { %v1654_v45 = vadd.f32 %v1637_v5, %v1630_v3 }
 0xcc9   : > { %1749 = vrot.lane.b32.xlu2 %v1654_v45, %s2422_s17  ;;  %1707 = vrot.lane.b32.xlu1 %v1654_v45, %s2423_s21  ;;  %v1683_v32 = vmul.f32 %v1666_v49, %v1654_v45 }
 0xcca   : > { %2307 = vset.pattern.permute.xlu0 %v2418_v18 }
 0xcd1   : > { %1776 = vperm.xlu2 %2301, %v2141_v40  }
 0xcd6   : > { %v1647_v8 = vpop.permute.xlu0 %1646 }
 0xcd7   : > { %v1656_v34 = vadd.f32 %v1647_v8, %v1632_v7 }
 0xcd9   : > { %v1685_v58 = vmul.f32 %v1676_v62, %v1656_v34  ;;  %1753 = vrot.lane.b32.xlu2 %v1656_v34, %s2422_s17  ;;  %1711 = vrot.lane.b32.xlu1 %v1656_v34, %s2423_s21 }
 0xcdb   : > { %v1705_v13 = vadd.f32 %v1697_v61, %v1685_v58 }
 0xcde   : > { %v1652_v36 = vpop.permute.xlu1 %1651 }
 0xcdf   : > { %v1657_v15 = vadd.f32 %v1652_v36, %v1633_v12  ;;  %v1735_v24 = vpop.permute.xlu0 %1734 }
 0xce1   : > { %1780 = vperm.xlu2 %2301, %v2142_v31   ;;  %1738 = vperm.xlu1 %2305, %v2142_v31   ;;  %v1686_v11 = vmul.f32 %v1681_v6, %v1657_v15  ;;  %v1703_v31 = vadd.f32 %v3025_v50, %v1683_v32 }
 0xce6   : > { %v1769_v17 = vpop.permute.xlu1 %1768 }
 0xce8   : > { %v1693_v19 = vpop.permute.xlu0 %1692 }
 0xce9   : > { %1713 = vrot.lane.b32.xlu1 %v1657_v15, %s2423_s21  ;;  %2306 = vset.pattern.permute.xlu2 %v2418_v18  ;;  %v1704_v46 = vadd.f32 %v1693_v19, %v3030_v59  ;;  %s352_s21 = sand.u32 1, %s2400_s10  }
 0xcea   : > { %2308 = vset.pattern.permute.xlu1 %v2419_v56  ;;  %s2096_s22 = sshll.u32 %s352_s21, 4  ;;  %s1989_s14 = scalar_lea.sflag [#allocation3], %s352_s21 }
 0xcf1   : > { %1755 = vrot.lane.b32.xlu1 %v1657_v15, %s2422_s17 }
 0xd13   : > { %v1710_v44 = vpop.permute.xlu2 %1709 }
 0xd14   : > { %v1722_v30 = vsel %vm1716_vm14, %v1710_v44, 0.0 }
 0xd15   : > { %v1742_v29 = vmul.f32 %v3027_v48, %v1722_v30 }
 0xd17   : > { %v1746_v1 = vadd.f32 %v1742_v29, %v1704_v46 }
 0xd23   : > { %v1750_v63 = vpop.permute.xlu2 %1749 }
 0xd24   : > { %v1763_v37 = vsel %vm1759_vm15, %v1750_v63, 0.0 }
 0xd25   : > { %v1783_v21 = vmul.f32 %v1769_v17, %v1763_v37 }
 0xd2b   : > { %v1777_v25 = vpop.permute.xlu2 %1776  ;;  %v1752_v38 = vpop.permute.xlu0 %1751 }
 0xd2c   : > { %v1764_v39 = vsel %vm1759_vm15, %v1752_v38, 0.0 }
 0xd2d   : > { %v1784_v47 = vmul.f32 %v1773_v35, %v1764_v39 }
 0xd2f   : > { %v1788_v60 = vadd.f32 %v1784_v47, %v1746_v1 }
 0xd31   : > { %v1798_v48 = vmul.f32 %v1796_v54, %v1788_v60  ;;  %vm1793_vm2 = vcmp.ge.f32.partialorder %v1788_v60, 0.0 }
 0xd33   : > { %v1754_v40 = vpop.permute.xlu2 %1753  ;;  %v1701_v51 = vpop.permute.xlu0 %1700  ;;  %v3058_v7 = vsel %vm1793_vm2, %v1788_v60, %v1798_v48 }
 0xd34   : > { %v1765_v43 = vsel %vm1759_vm15, %v1754_v40, 0.0  ;;  %v1706_v59 = vadd.f32 %v1701_v51, %v1686_v11  ;;  %v1815_v36 = vmul.f32 %v3058_v7, %v3058_v7 }
 0xd35   : > { %v1785_v49 = vmul.f32 %v1777_v25, %v1765_v43 }
 0xd3b   : > { %v1708_v20 = vpop.permute.xlu1 %1707 }
 0xd3c   : > { %v1721_v18 = vsel %vm1716_vm14, %v1708_v20, 0.0 }
 0xd3d   : > { %v1741_v23 = vmul.f32 %v1727_v9, %v1721_v18  ;;  %v1781_v9 = vpop.permute.xlu2 %1780 }
 0xd3f   : > { %v1745_v41 = vadd.f32 %v1741_v23, %v1703_v31 }
 0xd41   : > { %v1787_v61 = vadd.f32 %v1783_v21, %v1745_v41 }
 0xd43   : > { %v1797_v57 = vmul.f32 %v1796_v54, %v1787_v61  ;;  %vm1792_vm1 = vcmp.ge.f32.partialorder %v1787_v61, 0.0 }
 0xd45   : > { %v3055_v5 = vsel %vm1792_vm1, %v1787_v61, %v1797_v57 }
 0xd46   : > { %v1805_v15 = vadd.f32 %v3058_v7, %v3055_v5 }
 0xd4b   : > { %v1712_v27 = vpop.permute.xlu1 %1711 }
 0xd4c   : > { %v1723_v33 = vsel %vm1716_vm14, %v1712_v27, 0.0 }
 0xd4d   : > { %v1743_v2 = vmul.f32 %v1735_v24, %v1723_v33 }
 0xd4f   : > { %v1747_v52 = vadd.f32 %v1743_v2, %v1705_v13  ;;  %v1814_v13 = vmul.f32 %v3055_v5, %v3055_v5 }
 0xd51   : > { %v1789_v53 = vadd.f32 %v1785_v49, %v1747_v52  ;;  %v1818_v17 = vadd.f32 %v1815_v36, %v1814_v13 }
 0xd53   : > { %v1739_v4 = vpop.permute.xlu1 %1738  ;;  %v1799_v62 = vmul.f32 %v1796_v54, %v1789_v53  ;;  %vm1794_vm3 = vcmp.ge.f32.partialorder %v1789_v53, 0.0 }
 0xd55   : > { %v3060_v8 = vsel %vm1794_vm3, %v1789_v53, %v1799_v62 }
 0xd56   : > { %v1816_v11 = vmul.f32 %v3060_v8, %v3060_v8  ;;  %v1806_v44 = vadd.f32 %v1805_v15, %v3060_v8 }
 0xd58   : > { %v1819_v19 = vadd.f32 %v1818_v17, %v1816_v11 }
 0xd5b   : > { %v1714_v50 = vpop.permute.xlu1 %1713 }
 0xd5c   : > { %v1724_v55 = vsel %vm1716_vm14, %v1714_v50, 0.0 }
 0xd5d   : > { %v1744_v3 = vmul.f32 %v1739_v4, %v1724_v55 }
 0xd5f   : > { %v1748_v34 = vadd.f32 %v1744_v3, %v1706_v59 }
 0xd63   : > { %v1756_v45 = vpop.permute.xlu1 %1755 }
 0xd64   : > { %v1766_v6 = vsel %vm1759_vm15, %v1756_v45, 0.0 }
 0xd65   : > { %v1786_v58 = vmul.f32 %v1781_v9, %v1766_v6 }
 0xd67   : > { %v1790_v12 = vadd.f32 %v1786_v58, %v1748_v34 }
 0xd69   : > { %vm1795_vm6 = vcmp.ge.f32.partialorder %v1790_v12, 0.0  ;;  %v1800_v35 = vmul.f32 %v1796_v54, %v1790_v12 }
 0xd6b   : > { %v3071_v24 = vsel %vm1795_vm6, %v1790_v12, %v1800_v35 }
 0xd6c   : > { %v1817_v63 = vmul.f32 %v3071_v24, %v3071_v24  ;;  %v1807_v20 = vadd.f32 %v1806_v44, %v3071_v24 }
 0xd6e   : > { %v1808_v26 = vrot.slane %v1807_v20, 4  ;;  %v1820_v25 = vadd.f32 %v1819_v19, %v1817_v63 }
 0xd70   : > { %v1809_v27 = vadd.f32 %v1808_v26, %v1807_v20  ;;  %v1821_v28 = vrot.slane %v1820_v25, 4 }
 0xd72   : > { %v1810_v18 = vrot.slane %v1809_v27, 2  ;;  %v1822_v32 = vadd.f32 %v1821_v28, %v1820_v25 }
 0xd74   : > { %v1811_v33 = vadd.f32 %v1810_v18, %v1809_v27  ;;  %v1823_v38 = vrot.slane %v1822_v32, 2 }
 0xd76   : > { %v1812_v23 = vrot.slane %v1811_v33, 1  ;;  %v1824_v4 = vadd.f32 %v1823_v38, %v1822_v32 }
 0xd78   : > { %v1813_v30 = vadd.f32 %v1812_v23, %v1811_v33  ;;  %v1825_v40 = vrot.slane %v1824_v4, 1 }
 0xd7a   : > { %v1827_v31 = vsel %vm479_vm5, %v1813_v30, 0.0  ;;  %v1826_v2 = vadd.f32 %v1825_v40, %v1824_v4 }
 0xd7b   : > { %1828 = vadd.xlane.f32.xlu0 %v1827_v31 }
 0xd7c   : > { %v1838_v37 = vsel %vm479_vm5, %v1826_v2, 0.0 }
 0xd7d   : > { %1839 = vadd.xlane.f32.xlu1 %v1838_v37 }
 0xdee   : > { %v1829_v39 = vpop.xlane.xlu0 %1828 }
 0xdef   : > { %v1830_v29 = vrot.slane %v1829_v39, 4 }
 0xdf0   : > { %v1840_v41 = vpop.xlane.xlu1 %1839 }
 0xdf1   : > { %v1831_v43 = vadd.f32 %v1830_v29, %v1829_v39  ;;  %v1841_v46 = vrot.slane %v1840_v41, 4 }
 0xdf3   : > { %v1832_v21 = vrot.slane %v1831_v43, 2  ;;  %v1842_v47 = vadd.f32 %v1841_v46, %v1840_v41  ;;  %v2144_v41 = vld [vmem:[%s3150_s4 + $0x10] sm:$0xff] }
 0xdf5   : > { %v1843_v52 = vrot.slane %v1842_v47, 2  ;;  %v1833_v1 = vadd.f32 %v1832_v21, %v1831_v43 }
 0xdf7   : > { %v1834_v49 = vrot.slane %v1833_v1, 1  ;;  %v1844_v61 = vadd.f32 %v1843_v52, %v1842_v47 }
 0xdf9   : > { %v1835_v50 = vadd.f32 %v1834_v49, %v1833_v1  ;;  %v1845_v60 = vrot.slane %v1844_v61, 1 }
 0xdfb   : > { %2178 = vpush %v1835_v50  ;;  %v1846_v53 = vadd.f32 %v1845_v60, %v1844_v61 }
 0xdfd   : > { %2180 = vpush %v1846_v53 }
 0xe2c   : > { %s2179_s23 = spop %2178 }
 0xe2d   : > { %v1837_v54 = vstv %s2179_s23  ;;  %s2157_s23 = sshll.u32 %s2497_s13, 4 }
 0xe2e   : > { %v1849_v55 = vmul.f32 %v1837_v54, %v2582_v16  ;;  %s2181_s24 = spop %2180  ;;  %s2000_s26 = scalar_lea.hbm %s3155_s9, %s2157_s23 }
 0xe2f   : > { %v1848_v57 = vstv %s2181_s24  ;;  %s354_s24 = scalar_lea.vmem [#allocation5], %s2096_s22  ;;  %s2003_s29 = sshll.u32 %s2000_s26, 4  ;;  %s2004_s29 = int_to_ptr.hbm [resolvable:$true] %s2003_s29 }
 0xe30   : > { %v1850_v51 = vmul.f32 %v1848_v57, %v2582_v16  ;;  %v1851_v48 = vmul.f32 %v1849_v55, %v1849_v55  ;;  %s2001_s28 = sshll.u32 %s354_s24, 4  ;;  %s2356_s16 = sshra.s32 %s2004_s29, 4  ;;  %s2002_s28 = int_to_ptr.vmem [resolvable:$true] %s2001_s28  ;;  %s2357_s16 = int_to_ptr.hbm [resolvable:$true] %s2356_s16 }
 0xe31   : > { %s2358_s13 = scalar_lea.hbm %s2357_s16, 16  ;;  %s2362_s23 = scalar_lea.hbm %s3155_s9, 32 }
 0xe32   : > { %v1852_v62 = vsub.f32 %v1850_v51, %v1851_v48  ;;  %p2359_p0 = scmp.ne.s32.totalorder %s2357_s16, %s2358_s13  ;;  %p2363_p3 = scmp.lt.s32.totalorder %s2357_s16, %s3155_s9 }
 0xe33   : > { %p2364_p4 = scmp.lt.s32.totalorder %s2362_s23, %s2358_s13 }
 0xe34   : > { %v1853_v3 = vmax.f32 %v1852_v62, 0.0  ;;  %p2360_p1 = pnand %p2359_p0, %p2514_p5 }
 0xe35   : > { %p2365_p7 = por %p2364_p4, %p2363_p3 }
 0xe36   : > { %v1854_v59 = vadd.f32 1e-06, %v1853_v3  ;;  %p2361_p2 = pneg %p2360_p1 }
 0xe38   : > { %2325 = vrsqrt.f32 %v1854_v59  ;;  %vm1861_vm7 = vweird.f32 %v1854_v59  ;;  %p2366_p8 = pnand %p2365_p7, %p2361_p2 }
 0xe3e   : > { %v2326_v45 = vpop.eup %2325 }
 0xe3f   : > { %v1856_v9 = vmul.f32 %v2326_v45, %v1854_v59  ;;  %vm1862_vm5 = vweird.f32 %v2326_v45 }
 0xe40   : > { %vm1863_vm8 = vmor %vm1861_vm7, %vm1862_vm5 }
 0xe41   : > { %v1857_v6 = vmul.f32 %v2326_v45, %v1856_v9 }
 0xe43   : > { %v1858_v34 = vmul.f32 0.5, %v1857_v6 }
 0xe45   : > { %v1859_v58 = vsub.f32 1.5, %v1858_v34 }
 0xe47   : > { %v1860_v13 = vmul.f32 %v2326_v45, %v1859_v58 }
 0xe49   : > { %v1864_v12 = vsel %vm1863_vm8, %v2326_v45, %v1860_v13 }
 0xe4a   : > { %v1867_v36 = vmul.f32 %v2927_v42, %v1864_v12  ;;  %v1868_v15 = vmul.f32 %v2932_v10, %v1864_v12  ;;  %v1866_v35 = vmul.f32 %v2937_v14, %v1864_v12  ;;  %v1865_v17 = vmul.f32 %v2921_v22, %v1864_v12 }
 0xe4c   : > { %1905 = vperm.xlu0 %2307, %v1867_v36   ;;  %v1872_v16 = vmul.f32 %v1868_v15, %v1849_v55  ;;  %v1871_v11 = vmul.f32 %v1867_v36, %v1849_v55  ;;  %v1870_v44 = vmul.f32 %v1866_v35, %v1849_v55  ;;  %v1869_v63 = vmul.f32 %v1865_v17, %v1849_v55 }
 0xe4e   : > { %1883 = vrot.lane.b32.xlu2 %v1872_v16, %s2414_s27 }
 0xe54   : > { %2312 = vset.pattern.permute.xlu0 %v2411_v0 }
 0xe56   : > { %1881 = vrot.lane.b32.xlu2 %v1871_v11, %s2414_s27 }
 0xe5e   : > { %1879 = vrot.lane.b32.xlu2 %v1870_v44, %s2414_s27 }
 0xe66   : > { %1877 = vrot.lane.b32.xlu2 %v1869_v63, %s2414_s27 }
 0xe6e   : > { %1910 = vperm.xlu2 %2306, %v1868_v15  }
 0xe76   : > { %1900 = vperm.xlu2 %2306, %v1866_v35  }
 0xe7e   : > { %1895 = vperm.xlu2 %2306, %v1865_v17  }
 0xe86   : > { %2309 = vset.pattern.permute.xlu2 %v2419_v56 }
 0xea8   : > { %v1884_v20 = vpop.permute.xlu2 %1883 }
 0xea9   : > { %v1892_v19 = vsub.f32 %v2932_v10, %v1884_v20 }
 0xeab   : > { %1934 = vperm.xlu1 %2308, %v1892_v19  }
 0xeb0   : > { %v1882_v26 = vpop.permute.xlu2 %1881 }
 0xeb1   : > { %v1891_v25 = vsub.f32 %v2927_v42, %v1882_v26  ;;  %v2146_v42 = vld [vmem:[%s3151_s5 + $0x10] sm:$0xff] }
 0xeb3   : > { %1929 = vperm.xlu2 %2309, %v1891_v25  }
 0xeb8   : > { %v1880_v27 = vpop.permute.xlu2 %1879 }
 0xeb9   : > { %v1890_v28 = vsub.f32 %v2937_v14, %v1880_v27  ;;  %v2147_v14 = vld [vmem:[%s3151_s5 + $0x18] sm:$0xff] }
 0xebb   : > { %1924 = vperm.xlu1 %2308, %v1890_v28  }
 0xebe   : > { %v1906_v38 = vpop.permute.xlu0 %1905 }
 0xec0   : > { %v1878_v18 = vpop.permute.xlu2 %1877 }
 0xec1   : > { %v1889_v32 = vsub.f32 %v2921_v22, %v1878_v18 }
 0xec3   : > { %1919 = vperm.xlu2 %2309, %v1889_v32   ;;  %2310 = vset.pattern.permute.xlu1 %v2411_v0 }
 0xec4   : > { %1949 = vperm.xlu1 %2310, %v2146_v42  }
 0xec8   : > { %v1911_v56 = vpop.permute.xlu2 %1910 }
 0xec9   : > { %v1916_v23 = vmul.f32 %v1911_v56, %v3071_v24 }
 0xecb   : > { %2311 = vset.pattern.permute.xlu2 %v2411_v0  ;;  %v1915_v0 = vmul.f32 %v1906_v38, %v3060_v8  ;;  %v2145_v8 = vld [vmem:[%s3150_s4 + $0x18] sm:$0xff] }
 0xecc   : > { %1954 = vperm.xlu2 %2311, %v2147_v14  }
 0xed0   : > { %v1901_v33 = vpop.permute.xlu2 %1900 }
 0xed1   : > { %v1914_v31 = vmul.f32 %v1901_v33, %v3058_v7 }
 0xed8   : > { %v1896_v10 = vpop.permute.xlu2 %1895 }
 0xed9   : > { %v1913_v39 = vmul.f32 %v1896_v10, %v3055_v5 }
 0xf0d   : > { %v1930_v22 = vpop.permute.xlu2 %1929 }
 0xf0e   : > { %v1939_v40 = vadd.f32 %v1930_v22, %v1915_v0 }
 0xf1d   : > { %v1935_v4 = vpop.permute.xlu1 %1934  ;;  %v1920_v2 = vpop.permute.xlu2 %1919 }
 0xf1e   : > { %v1940_v30 = vadd.f32 %v1935_v4, %v1916_v23  ;;  %v1937_v24 = vadd.f32 %v1920_v2, %v1913_v39 }
 0xf20   : > { %1975 = vmatpush.msrb.mxu1 %v1940_v30 }
 0xf22   : > { %1976 = vmatpush.msrb.mxu1 %v1939_v40 }
 0xf26   : > { %v1955_v46 = vpop.permute.xlu2 %1954 }
 0xf2d   : > { %v1925_v37 = vpop.permute.xlu1 %1924 }
 0xf2e   : > { %v1938_v29 = vadd.f32 %v1925_v37, %v1914_v31 }
 0xf30   : > { %1977 = vmatpush.msrb.mxu1 %v1938_v29 }
 0xf32   : > { %1978 = vmatpush.msrb.mxu1 %v1937_v24 }
 0xf33   : > { %2148 = vmatmul.msk.f32.vlgmr.msrb.gmra.mxu1 %vm901_vm4, %v2144_v41 }
 0xf36   : > { %v1950_v7 = vpop.permute.xlu1 %1949 }
 0xf3b   : > { %2149 = vmatmul.msk.f32.gmra.mxu1 %vm901_vm4, %v2145_v8 }
 0xfb0   : > { %v1980_v5 = vpop.f32.mrf.mxu1 }
 0xfb1   : > { %v1981_v43 = vadd.f32 %v1980_v5, %v1950_v7 }
 0xfb3   : > { %1986 = vst [vmem:[%s354_s24] sm:$0xff] %v1981_v43 }
 0xfb8   : > { %v1983_v21 = vpop.f32.mrf.mxu1 }
 0xfb9   : > { %v1984_v47 = vadd.f32 %v1983_v21, %v1955_v46 }
 0xfbb   : > { %1987 = vst [vmem:[%s354_s24 + $0x8] sm:$0xff] %v1984_v47 }
 0xfbc   : > { %2369 = shalt.err (!%p2366_p8)
}
 0xfbd   : > { %s2424_s21 = smov 128   ;;  %s2425_s24 = smov 8  }
 0xfbe   : > { %2186 = dma.vmem_to_hbm [thread:$0]  (%p2514_p5), %s2002_s28, 256, %s2004_s29, %s1989_s14, %s2424_s21, %s2424_s21, %s2425_s24  }
 0xfbf PF: > { %p2198_p9 = scmp.ge.s32.totalorder %s2408_s12, 2  ;;  %s2018_s26 = sand.u32 1, %s2396_s30  }
 0xfc0   : > { %s2019_s17 = scalar_lea.sflag [#allocation3], %s2018_s26 }
 0xfc1   : > { %p2193_p10 = pnand %p2198_p9, %p2518_p6 }
 0xfc3   : > { %p2194_p11 = pneg %p2193_p10 }
 0xfc5   : > { %2391 = dma.done.wait (%p2194_p11), %s2019_s17, 256  }
 0xfc6   : > { %2393 = vsyncadd (%p2194_p11), %s2019_s17, 4294967040  ;;  %p20_p12 = scmp.ge.s32.totalorder %s2501_s15, 4   ;;  %s3158_s30 = smov %s2400_s10 }
 0xfc7   : > { %s3159_s10 = smov %s2404_s11  ;;  %s3160_s11 = smov %s2512_s18 }
 0xfc8   : > { %s3161_s12 = smov %s2501_s15  ;;  %22 = sbr.rel (!%p20_p12) target bundleno = 4 (0x4), region = 107 }
 0xfcd   :  { %2025 = vsyncpa [#allocation3], 1 }
 0xfce   :  { %2027 = vsyncpa [#allocation3 + $0x1], 1 }
 0xfcf   :  { %2028 = vsyncpa [#allocation4], 1 }
 0xfd0   :  { %2030 = vsyncpa [#allocation4 + $0x1], 1 }

</bundles_post_ra>
